<compile_context>
chip_gen: v5e
topology: v5e:2x2
jax: 0.10.0
libtpu: 0.0.40
codegen_flags: <defaults>
</compile_context>

<pallas_src>
import functools

import jax
import jax.numpy as jnp
from jax.experimental import pallas as pl
from jax.experimental.pallas import tpu as pltpu


def _grouped_conv_kernel(x_ref, w_ref, b_ref, o_ref, col_ref, *, KH, KW, OH, OW):
    # x_ref:   (N, H, W, Cin_g)            activations of this group (NHWC, lane-dense C)
    # w_ref:   (1, KH*KW*Cin_g, Cout_g)    pre-fused weights of this group
    # b_ref:   (1, 1, Cout_g)              bias of this group
    # o_ref:   (N, OH, OW, Cout_g)         output of this group
    # col_ref: (N*OH*OW, KH*KW*Cin_g)      VMEM scratch: full im2col slab (~576 KiB f32)
    N = x_ref.shape[0]
    Cin_g = x_ref.shape[-1]
    Cout_g = w_ref.shape[-1]
    M = N * OH * OW

    # Build the im2col slab with KH*KW (=9) static copies. Each source slice keeps
    # the lane-dense channel axis intact, and OW == 8 makes the (N, OH, OW) -> M
    # collapse a pure (8,128)-tile relabel. Every destination column offset is a
    # multiple of Cin_g = 128, i.e. lane-aligned.
    for kh in range(KH):
        for kw in range(KW):
            col = (kh * KW + kw) * Cin_g
            patch = x_ref[:, kh:kh + OH, kw:kw + OW, :]          # (N, OH, OW, Cin_g)
            col_ref[:, col:col + Cin_g] = patch.reshape(M, Cin_g)

    # Single fused MXU contraction per group: [M, KH*KW*Cin_g] x [KH*KW*Cin_g, Cout_g],
    # accumulate in f32 inside the MXU, add bias, write straight to the output block.
    out = jnp.dot(col_ref[...], w_ref[0], preferred_element_type=jnp.float32)
    out = out + b_ref[0].astype(jnp.float32)                     # (M, Cout_g)
    o_ref[...] = out.reshape(N, OH, OW, Cout_g).astype(o_ref.dtype)


def prepare_params(w_oihw, bias, *, groups):
    """One-time ("model build time") layout fusion of weights / bias.

    OIHW (Cout, Cin_g, KH, KW) -> (G, KH*KW*Cin_g, Cout_g), with fused row index
    (kh*KW + kw)*Cin_g + cin matching the in-kernel im2col column order.
    """
    Cout, Cin_g, KH, KW = w_oihw.shape
    assert Cout % groups == 0
    Cout_g = Cout // groups
    w = w_oihw.reshape(groups, Cout_g, Cin_g, KH, KW)
    w = jnp.transpose(w, (0, 3, 4, 2, 1)).reshape(groups, KH * KW * Cin_g, Cout_g)
    b = bias.reshape(groups, 1, Cout_g)
    return w, b


def grouped_conv2d_pallas(x_nhwc, w_fused, b_fused, *, groups, kernel_size):
    """Valid (no-padding) stride-1 grouped conv on NHWC with pre-fused weights."""
    N, H, W, Cin = x_nhwc.shape
    KH, KW = kernel_size
    G, KKC, Cout_g = w_fused.shape
    assert G == groups and Cin % groups == 0
    Cin_g = Cin // groups
    assert KKC == KH * KW * Cin_g
    Cout = Cout_g * groups
    OH, OW = H - KH + 1, W - KW + 1
    M = N * OH * OW

    kernel = functools.partial(_grouped_conv_kernel, KH=KH, KW=KW, OH=OH, OW=OW)

    return pl.pallas_call(
        kernel,
        out_shape=jax.ShapeDtypeStruct((N, OH, OW, Cout), x_nhwc.dtype),
        grid_spec=pltpu.PrefetchScalarGridSpec(
            num_scalar_prefetch=0,
            grid=(groups,),  # one channel group per grid step
            in_specs=[
                pl.BlockSpec((N, H, W, Cin_g), lambda g: (0, 0, 0, g)),
                pl.BlockSpec((1, KKC, Cout_g), lambda g: (g, 0, 0)),
                pl.BlockSpec((1, 1, Cout_g), lambda g: (g, 0, 0)),
            ],
            out_specs=pl.BlockSpec((N, OH, OW, Cout_g), lambda g: (0, 0, 0, g)),
            scratch_shapes=[
                pltpu.VMEM((M, KKC), x_nhwc.dtype),  # im2col slab
            ],
        ),
        compiler_params=pltpu.CompilerParams(
            dimension_semantics=("parallel",),
        ),
    )(x_nhwc, w_fused, b_fused)


@functools.partial(jax.jit, static_argnames=("groups", "kernel_size"))
def conv_forward_nhwc(x_nhwc, w_fused, b_fused, *, groups, kernel_size):
    """Optimized NHWC-native forward (no layout transposes in the hot path)."""
    return grouped_conv2d_pallas(x_nhwc, w_fused, b_fused,
                                 groups=groups, kernel_size=kernel_size)


@functools.partial(jax.jit, static_argnames=("groups", "kernel_size"))
def test_model_forward_nchw(x_nchw, w_fused, b_fused, *, groups, kernel_size):
    """NCHW compatibility wrapper mirroring testModel2.forward exactly."""
    x_nhwc = jnp.transpose(x_nchw, (0, 2, 3, 1))
    out_nhwc = grouped_conv2d_pallas(x_nhwc, w_fused, b_fused,
                                     groups=groups, kernel_size=kernel_size)
    return jnp.transpose(out_nhwc, (0, 3, 1, 2))


if __name__ == "__main__":
    # Channels are dictated by the module (Cin=256, Cout=512, k=3, groups=2);
    # keep batch/spatial small.
    N, Cin, H, W = 2, 256, 10, 10
    Cout, K, G = 512, 3, 2

    key = jax.random.PRNGKey(0)
    kx, kw_key, kb_key = jax.random.split(key, 3)

    x_nchw = jax.random.normal(kx, (N, Cin, H, W), dtype=jnp.float32)
    fan_in = (Cin // G) * K * K
    bound = 1.0 / float(fan_in) ** 0.5
    w = jax.random.uniform(kw_key, (Cout, Cin // G, K, K), jnp.float32, -bound, bound)
    b = jax.random.uniform(kb_key, (Cout,), jnp.float32, -bound, bound)

    # "Model build time": fuse the weight/bias layout once, outside the forward path.
    w_fused, b_fused = prepare_params(w, b, groups=G)

    # Primary optimized path: surrounding graph feeds/consumes NHWC directly.
    x_nhwc = jnp.transpose(x_nchw, (0, 2, 3, 1))
    out_nhwc = conv_forward_nhwc(x_nhwc, w_fused, b_fused, groups=G, kernel_size=(K, K))
    out_nhwc = jax.block_until_ready(out_nhwc)
    assert out_nhwc.shape == (N, H - K + 1, W - K + 1, Cout), out_nhwc.shape

    # Compatibility path matching the PyTorch NCHW interface.
    out_nchw = test_model_forward_nchw(x_nchw, w_fused, b_fused,
                                       groups=G, kernel_size=(K, K))
    out_nchw = jax.block_until_ready(out_nchw)
    assert out_nchw.shape == (N, Cout, H - K + 1, W - K + 1), out_nchw.shape

    # Cross-check against XLA's grouped conv to validate semantics.
    ref_nchw = jax.lax.conv_general_dilated(
        x_nchw, w, window_strides=(1, 1), padding="VALID",
        dimension_numbers=("NCHW", "OIHW", "NCHW"),
        feature_group_count=G,
    ) + b.reshape(1, Cout, 1, 1)
    ref_nhwc = jnp.transpose(ref_nchw, (0, 2, 3, 1))

    if not jnp.allclose(out_nhwc, ref_nhwc, atol=1e-3, rtol=1e-3):
        raise AssertionError("Pallas grouped conv (NHWC path) mismatch vs reference")
    if not jnp.allclose(out_nchw, ref_nchw, atol=1e-3, rtol=1e-3):
        raise AssertionError("Pallas grouped conv (NCHW compat path) mismatch vs reference")

    print("KERNEL_OK")
</pallas_src>

<mosaic_0001>
module attributes {stable_mosaic.version = 11 : i64} {
  func.func @_grouped_conv_kernel(%arg0: i32, %arg1: memref<2x10x10x128xf32, #tpu.memory_space<vmem>>, %arg2: memref<1x1152x256xf32, #tpu.memory_space<vmem>>, %arg3: memref<1x1x256xf32, #tpu.memory_space<vmem>>, %arg4: memref<2x8x8x256xf32, #tpu.memory_space<vmem>>, %arg5: memref<128x1152xf32, #tpu.memory_space<vmem>>) attributes {dimension_semantics = [#tpu.dimension_semantics<parallel>], iteration_bounds = array<i64: 2>, scalar_prefetch = 0 : i64, scratch_operands = 1 : i64, tpu.core_type = #tpu.core_type<tc>, window_params = [{transform_indices = @transform_0, window_bounds = array<i64: 2, 10, 10, 128>}, {transform_indices = @transform_1, window_bounds = array<i64: 1, 1152, 256>}, {transform_indices = @transform_2, window_bounds = array<i64: 1, 1, 256>}, {transform_indices = @transform_3, window_bounds = array<i64: 2, 8, 8, 256>}]} {
    %c0 = arith.constant 0 : index
    %c0_0 = arith.constant 0 : index
    %c0_1 = arith.constant 0 : index
    %c0_2 = arith.constant 0 : index
    %0 = vector.load %arg1[%c0, %c0_0, %c0_1, %c0_2] : memref<2x10x10x128xf32, #tpu.memory_space<vmem>>, vector<2x8x8x128xf32>
    %1 = vector.shape_cast %0 : vector<2x8x8x128xf32> to vector<128x128xf32>
    %c0_3 = arith.constant 0 : index
    %c0_4 = arith.constant 0 : index
    %2 = vector.load %arg5[%c0_3, %c0_4] : memref<128x1152xf32, #tpu.memory_space<vmem>>, vector<128x128xf32>
    tpu.vector_store %arg5[%c0_3, %c0_4], %1 {strides = array<i32>} : memref<128x1152xf32, #tpu.memory_space<vmem>>, vector<128x128xf32>,
    %c0_5 = arith.constant 0 : index
    %c0_6 = arith.constant 0 : index
    %c1 = arith.constant 1 : index
    %c0_7 = arith.constant 0 : index
    %3 = vector.load %arg1[%c0_5, %c0_6, %c1, %c0_7] : memref<2x10x10x128xf32, #tpu.memory_space<vmem>>, vector<2x8x8x128xf32>
    %4 = vector.shape_cast %3 : vector<2x8x8x128xf32> to vector<128x128xf32>
    %c0_8 = arith.constant 0 : index
    %c128 = arith.constant 128 : index
    %5 = vector.load %arg5[%c0_8, %c128] : memref<128x1152xf32, #tpu.memory_space<vmem>>, vector<128x128xf32>
    tpu.vector_store %arg5[%c0_8, %c128], %4 {strides = array<i32>} : memref<128x1152xf32, #tpu.memory_space<vmem>>, vector<128x128xf32>,
    %c0_9 = arith.constant 0 : index
    %c0_10 = arith.constant 0 : index
    %c2 = arith.constant 2 : index
    %c0_11 = arith.constant 0 : index
    %6 = vector.load %arg1[%c0_9, %c0_10, %c2, %c0_11] : memref<2x10x10x128xf32, #tpu.memory_space<vmem>>, vector<2x8x8x128xf32>
    %7 = vector.shape_cast %6 : vector<2x8x8x128xf32> to vector<128x128xf32>
    %c0_12 = arith.constant 0 : index
    %c256 = arith.constant 256 : index
    %8 = vector.load %arg5[%c0_12, %c256] : memref<128x1152xf32, #tpu.memory_space<vmem>>, vector<128x128xf32>
    tpu.vector_store %arg5[%c0_12, %c256], %7 {strides = array<i32>} : memref<128x1152xf32, #tpu.memory_space<vmem>>, vector<128x128xf32>,
    %c0_13 = arith.constant 0 : index
    %c1_14 = arith.constant 1 : index
    %c0_15 = arith.constant 0 : index
    %c0_16 = arith.constant 0 : index
    %9 = vector.load %arg1[%c0_13, %c1_14, %c0_15, %c0_16] : memref<2x10x10x128xf32, #tpu.memory_space<vmem>>, vector<2x8x8x128xf32>
    %10 = vector.shape_cast %9 : vector<2x8x8x128xf32> to vector<128x128xf32>
    %c0_17 = arith.constant 0 : index
    %c384 = arith.constant 384 : index
    %11 = vector.load %arg5[%c0_17, %c384] : memref<128x1152xf32, #tpu.memory_space<vmem>>, vector<128x128xf32>
    tpu.vector_store %arg5[%c0_17, %c384], %10 {strides = array<i32>} : memref<128x1152xf32, #tpu.memory_space<vmem>>, vector<128x128xf32>,
    %c0_18 = arith.constant 0 : index
    %c1_19 = arith.constant 1 : index
    %c1_20 = arith.constant 1 : index
    %c0_21 = arith.constant 0 : index
    %12 = vector.load %arg1[%c0_18, %c1_19, %c1_20, %c0_21] : memref<2x10x10x128xf32, #tpu.memory_space<vmem>>, vector<2x8x8x128xf32>
    %13 = vector.shape_cast %12 : vector<2x8x8x128xf32> to vector<128x128xf32>
    %c0_22 = arith.constant 0 : index
    %c512 = arith.constant 512 : index
    %14 = vector.load %arg5[%c0_22, %c512] : memref<128x1152xf32, #tpu.memory_space<vmem>>, vector<128x128xf32>
    tpu.vector_store %arg5[%c0_22, %c512], %13 {strides = array<i32>} : memref<128x1152xf32, #tpu.memory_space<vmem>>, vector<128x128xf32>,
    %c0_23 = arith.constant 0 : index
    %c1_24 = arith.constant 1 : index
    %c2_25 = arith.constant 2 : index
    %c0_26 = arith.constant 0 : index
    %15 = vector.load %arg1[%c0_23, %c1_24, %c2_25, %c0_26] : memref<2x10x10x128xf32, #tpu.memory_space<vmem>>, vector<2x8x8x128xf32>
    %16 = vector.shape_cast %15 : vector<2x8x8x128xf32> to vector<128x128xf32>
    %c0_27 = arith.constant 0 : index
    %c640 = arith.constant 640 : index
    %17 = vector.load %arg5[%c0_27, %c640] : memref<128x1152xf32, #tpu.memory_space<vmem>>, vector<128x128xf32>
    tpu.vector_store %arg5[%c0_27, %c640], %16 {strides = array<i32>} : memref<128x1152xf32, #tpu.memory_space<vmem>>, vector<128x128xf32>,
    %c0_28 = arith.constant 0 : index
    %c2_29 = arith.constant 2 : index
    %c0_30 = arith.constant 0 : index
    %c0_31 = arith.constant 0 : index
    %18 = vector.load %arg1[%c0_28, %c2_29, %c0_30, %c0_31] : memref<2x10x10x128xf32, #tpu.memory_space<vmem>>, vector<2x8x8x128xf32>
    %19 = vector.shape_cast %18 : vector<2x8x8x128xf32> to vector<128x128xf32>
    %c0_32 = arith.constant 0 : index
    %c768 = arith.constant 768 : index
    %20 = vector.load %arg5[%c0_32, %c768] : memref<128x1152xf32, #tpu.memory_space<vmem>>, vector<128x128xf32>
    tpu.vector_store %arg5[%c0_32, %c768], %19 {strides = array<i32>} : memref<128x1152xf32, #tpu.memory_space<vmem>>, vector<128x128xf32>,
    %c0_33 = arith.constant 0 : index
    %c2_34 = arith.constant 2 : index
    %c1_35 = arith.constant 1 : index
    %c0_36 = arith.constant 0 : index
    %21 = vector.load %arg1[%c0_33, %c2_34, %c1_35, %c0_36] : memref<2x10x10x128xf32, #tpu.memory_space<vmem>>, vector<2x8x8x128xf32>
    %22 = vector.shape_cast %21 : vector<2x8x8x128xf32> to vector<128x128xf32>
    %c0_37 = arith.constant 0 : index
    %c896 = arith.constant 896 : index
    %23 = vector.load %arg5[%c0_37, %c896] : memref<128x1152xf32, #tpu.memory_space<vmem>>, vector<128x128xf32>
    tpu.vector_store %arg5[%c0_37, %c896], %22 {strides = array<i32>} : memref<128x1152xf32, #tpu.memory_space<vmem>>, vector<128x128xf32>,
    %c0_38 = arith.constant 0 : index
    %c2_39 = arith.constant 2 : index
    %c2_40 = arith.constant 2 : index
    %c0_41 = arith.constant 0 : index
    %24 = vector.load %arg1[%c0_38, %c2_39, %c2_40, %c0_41] : memref<2x10x10x128xf32, #tpu.memory_space<vmem>>, vector<2x8x8x128xf32>
    %25 = vector.shape_cast %24 : vector<2x8x8x128xf32> to vector<128x128xf32>
    %c0_42 = arith.constant 0 : index
    %c1024 = arith.constant 1024 : index
    %26 = vector.load %arg5[%c0_42, %c1024] : memref<128x1152xf32, #tpu.memory_space<vmem>>, vector<128x128xf32>
    tpu.vector_store %arg5[%c0_42, %c1024], %25 {strides = array<i32>} : memref<128x1152xf32, #tpu.memory_space<vmem>>, vector<128x128xf32>,
    %c0_43 = arith.constant 0 : index
    %c0_44 = arith.constant 0 : index
    %27 = vector.load %arg5[%c0_43, %c0_44] : memref<128x1152xf32, #tpu.memory_space<vmem>>, vector<128x1152xf32>
    %c0_45 = arith.constant 0 : index
    %c0_46 = arith.constant 0 : index
    %c0_47 = arith.constant 0 : index
    %28 = vector.load %arg2[%c0_45, %c0_46, %c0_47] : memref<1x1152x256xf32, #tpu.memory_space<vmem>>, vector<1x1152x256xf32>
    %29 = vector.shape_cast %28 : vector<1x1152x256xf32> to vector<1152x256xf32>
    %cst = arith.constant dense<0.000000e+00> : vector<128x256xf32>
    %30 = tpu.matmul %27, %29, %cst {dimension_numbers = #tpu.dot_dimension_numbers<[1], [0], [0], [1], [0, 0, 1, 1], [], []>} : vector<128x1152xf32>, vector<1152x256xf32>, vector<128x256xf32> -> vector<128x256xf32>
    %c0_48 = arith.constant 0 : index
    %c0_49 = arith.constant 0 : index
    %c0_50 = arith.constant 0 : index
    %31 = vector.load %arg3[%c0_48, %c0_49, %c0_50] : memref<1x1x256xf32, #tpu.memory_space<vmem>>, vector<1x1x256xf32>
    %32 = vector.shape_cast %31 : vector<1x1x256xf32> to vector<1x256xf32>
    %33 = vector.broadcast %32 : vector<1x256xf32> to vector<128x256xf32>
    %34 = arith.addf %30, %33 : vector<128x256xf32>
    %35 = vector.shape_cast %34 : vector<128x256xf32> to vector<2x8x8x256xf32>
    %c0_51 = arith.constant 0 : index
    %c0_52 = arith.constant 0 : index
    %c0_53 = arith.constant 0 : index
    %c0_54 = arith.constant 0 : index
    %36 = vector.load %arg4[%c0_51, %c0_52, %c0_53, %c0_54] : memref<2x8x8x256xf32, #tpu.memory_space<vmem>>, vector<2x8x8x256xf32>
    tpu.vector_store %arg4[%c0_51, %c0_52, %c0_53, %c0_54], %35 {strides = array<i32>} : memref<2x8x8x256xf32, #tpu.memory_space<vmem>>, vector<2x8x8x256xf32>,
    return
  }
  func.func @transform_0(%arg0: i32) -> (i32, i32, i32, i32) {
    %c0_i32 = arith.constant 0 : i32
    %c0_i32_0 = arith.constant 0 : i32
    %c0_i32_1 = arith.constant 0 : i32
    %c0_i32_2 = arith.constant 0 : i32
    return %c0_i32, %c0_i32_0, %c0_i32_1, %arg0 : i32, i32, i32, i32
  }
  func.func @transform_1(%arg0: i32) -> (i32, i32, i32) {
    %c0_i32 = arith.constant 0 : i32
    %c0_i32_0 = arith.constant 0 : i32
    %c0_i32_1 = arith.constant 0 : i32
    return %arg0, %c0_i32, %c0_i32_0 : i32, i32, i32
  }
  func.func @transform_2(%arg0: i32) -> (i32, i32, i32) {
    %c0_i32 = arith.constant 0 : i32
    %c0_i32_0 = arith.constant 0 : i32
    %c0_i32_1 = arith.constant 0 : i32
    return %arg0, %c0_i32, %c0_i32_0 : i32, i32, i32
  }
  func.func @transform_3(%arg0: i32) -> (i32, i32, i32, i32) {
    %c0_i32 = arith.constant 0 : i32
    %c0_i32_0 = arith.constant 0 : i32
    %c0_i32_1 = arith.constant 0 : i32
    %c0_i32_2 = arith.constant 0 : i32
    return %c0_i32, %c0_i32_0, %c0_i32_1, %arg0 : i32, i32, i32, i32
  }
}

</mosaic_0001>

<bundles_post_ra>
// kernel: conv_forward_nhwc.1
= control target key start
LH: loop header
LB: loop body
LE: loop exit
PB: predicated region body
PF: predicated region fallthrough
CT: control target
= control target key end

     0   :  { %s4272_s0 = inlined_call_operand.vmem [shape: f32[2,10,10,256], index: 0, kind: input, shape index: {}]   ;;  %s4273_s1 = inlined_call_operand.hbm [shape: f32[2,1152,256], index: 1, kind: input, shape index: {}]   ;;  %s4274_s2 = inlined_call_operand.hbm [shape: f32[2,1,256], index: 2, kind: input, shape index: {}]   ;;  %s4275_s3 = inlined_call_operand.hbm [shape: f32[2,8,8,512], index: 3, kind: output, shape index: {}]  }
   0x1   :  { %4279 = sst [smem:[#allocation17_spill]] %s4272_s0 }
   0x2   :  { %8 = vsyncpa [#allocation5], 0 }
   0x3   :  { %10 = vsyncpa [#allocation5 + $0x1], 0 }
   0x4   :  { %11 = vsyncpa [#allocation8], 0 }
   0x5   :  { %13 = vsyncpa [#allocation8 + $0x1], 0 }
   0x6   :  { %14 = vsyncpa [#allocation6], 0 }
   0x7   :  { %16 = vsyncpa [#allocation6 + $0x1], 0  ;;  %s2924_s12 = smov 0   ;;  %s2926_s13 = smov 0  }
   0x8   :  { %s2928_s14 = smov 0   ;;  %s2930_s15 = smov 0  }
   0x9 LB: > { %s2945_s16 = sadd.s32 4294967295, %s2897_s15   ;;  %s2502_s17 = sadd.s32 4294967294, %s2897_s15   ;;  %s2897_s15 = sphi %s2930_s15, %s4296_s15   ;;  %s2893_s14 = sphi %s2928_s14, %s4295_s14   ;;  %s2889_s13 = sphi %s2926_s13, %s4294_s13   ;;  %s2885_s12 = sphi %s2924_s12, %s4293_s12  }
   0xa   : > { %s2949_s18 = sadd.s32 1, %s2897_s15   ;;  %s29_s19 = sadd.s32 1, %s2893_s14 }
   0xb   : > { %s26_s20 = ssub.s32 %s2897_s15, %s2949_s18  ;;  %p36_p0 = scmp.ne.s32.totalorder %s2893_s14, %s2889_s13 }
   0xc   : > { %p27_p1 = scmp.eq.s32.totalorder %s26_s20, 0  ;;  %p37_p2 = scmp.eq.s32.totalorder %s2897_s15, 0 }
   0xd   : > { %p68_p3 = scmp.ne.s32.totalorder %s2889_s13, %s2885_s12  ;;  %p69_p4 = scmp.eq.s32.totalorder %s2945_s16, 0 }
   0xe   : > { %s2961_s21 = scalar_select %p27_p1, %s2893_s14, %s29_s19  }
   0xf   : > { %p2963_p5 = por %p37_p2, %p36_p0  ;;  %p2967_p6 = por %p69_p4, %p68_p3 }
  0x10   : > { %p118_p7 = scmp.eq.s32.totalorder %s2945_s16, 1  ;;  %p124_p8 = scmp.eq.s32.totalorder %s2502_s17, 1 }
  0x11   : > { %p2504_p11 = scmp.ge.s32.totalorder %s2897_s15, 2 }
  0x12   : > { %p2972_p9 = por %p118_p7, %p36_p0  ;;  %p2976_p10 = por %p124_p8, %p68_p3 }
  0x13   : > { %140 = sbr.rel (%p2504_p11) target bundleno = 106 (0x6a), region = 16 }
  0x18   : > { %143 = sbr.rel (!%p2963_p5) target bundleno = 74 (0x4a), region = 20  ;;  %s145_s26 = sand.u32 (%p2963_p5), 1, %s2893_s14  }
  0x19   : > { %s2505_s27 = sshll.u32 (%p2963_p5), %s2897_s15, 3  ;;  %s2646_s28 = smul.u32 (%p2963_p5), 320, %s145_s26 }
  0x1a   : > { %s4284_s0 = sld [smem:[#allocation17_spill]] (%p2963_p5) }
  0x1b   : > { %s2995_s5 = scalar_lea.vmem (%p2963_p5), [#allocation3], %s2646_s28 }
  0x20   : > { %s2990_s4 = scalar_lea.vmem %s4284_s0, %s2505_s27 }
  0x21   : > { %v256_v0 = vld [vmem:[%s2990_s4] sm:$0xff]  ;;  %v258_v1 = vld [vmem:[%s2990_s4 + $0x10] sm:$0xff] }
  0x22   : > { %v260_v2 = vld [vmem:[%s2990_s4 + $0x20] sm:$0xff]  ;;  %257 = vst [vmem:[%s2995_s5] sm:$0xff] %v256_v0  ;;  %v262_v3 = vld [vmem:[%s2990_s4 + $0x30] sm:$0xff] }
  0x23   : > { %259 = vst [vmem:[%s2995_s5 + $0x8] sm:$0xff] %v258_v1  ;;  %v264_v4 = vld [vmem:[%s2990_s4 + $0x40] sm:$0xff]  ;;  %v266_v5 = vld [vmem:[%s2990_s4 + $0x50] sm:$0xff] }
  0x24   : > { %261 = vst [vmem:[%s2995_s5 + $0x10] sm:$0xff] %v260_v2  ;;  %v268_v6 = vld [vmem:[%s2990_s4 + $0x60] sm:$0xff]  ;;  %v270_v7 = vld [vmem:[%s2990_s4 + $0x70] sm:$0xff] }
  0x25   : > { %263 = vst [vmem:[%s2995_s5 + $0x18] sm:$0xff] %v262_v3  ;;  %v272_v8 = vld [vmem:[%s2990_s4 + $0x80] sm:$0xff]  ;;  %v274_v9 = vld [vmem:[%s2990_s4 + $0x90] sm:$0xff] }
  0x26   : > { %265 = vst [vmem:[%s2995_s5 + $0x20] sm:$0xff] %v264_v4  ;;  %v276_v10 = vld [vmem:[%s2990_s4 + $0xa0] sm:$0xff]  ;;  %v278_v11 = vld [vmem:[%s2990_s4 + $0xb0] sm:$0xff] }
  0x27   : > { %267 = vst [vmem:[%s2995_s5 + $0x28] sm:$0xff] %v266_v5  ;;  %v280_v12 = vld [vmem:[%s2990_s4 + $0xc0] sm:$0xff]  ;;  %v282_v13 = vld [vmem:[%s2990_s4 + $0xd0] sm:$0xff] }
  0x28   : > { %269 = vst [vmem:[%s2995_s5 + $0x30] sm:$0xff] %v268_v6  ;;  %v284_v14 = vld [vmem:[%s2990_s4 + $0xe0] sm:$0xff]  ;;  %v286_v15 = vld [vmem:[%s2990_s4 + $0xf0] sm:$0xff] }
  0x29   : > { %271 = vst [vmem:[%s2995_s5 + $0x38] sm:$0xff] %v270_v7  ;;  %v288_v16 = vld [vmem:[%s2990_s4 + $0x100] sm:$0xff]  ;;  %v290_v17 = vld [vmem:[%s2990_s4 + $0x110] sm:$0xff] }
  0x2a   : > { %273 = vst [vmem:[%s2995_s5 + $0x40] sm:$0xff] %v272_v8  ;;  %v292_v18 = vld [vmem:[%s2990_s4 + $0x120] sm:$0xff]  ;;  %v294_v19 = vld [vmem:[%s2990_s4 + $0x130] sm:$0xff] }
  0x2b   : > { %275 = vst [vmem:[%s2995_s5 + $0x48] sm:$0xff] %v274_v9  ;;  %v296_v20 = vld [vmem:[%s2990_s4 + $0x140] sm:$0xff]  ;;  %v298_v21 = vld [vmem:[%s2990_s4 + $0x150] sm:$0xff] }
  0x2c   : > { %277 = vst [vmem:[%s2995_s5 + $0x50] sm:$0xff] %v276_v10  ;;  %v300_v22 = vld [vmem:[%s2990_s4 + $0x160] sm:$0xff]  ;;  %v302_v23 = vld [vmem:[%s2990_s4 + $0x170] sm:$0xff] }
  0x2d   : > { %279 = vst [vmem:[%s2995_s5 + $0x58] sm:$0xff] %v278_v11  ;;  %v304_v24 = vld [vmem:[%s2990_s4 + $0x180] sm:$0xff]  ;;  %v306_v25 = vld [vmem:[%s2990_s4 + $0x190] sm:$0xff] }
  0x2e   : > { %281 = vst [vmem:[%s2995_s5 + $0x60] sm:$0xff] %v280_v12  ;;  %v308_v26 = vld [vmem:[%s2990_s4 + $0x1a0] sm:$0xff]  ;;  %v310_v27 = vld [vmem:[%s2990_s4 + $0x1b0] sm:$0xff] }
  0x2f   : > { %283 = vst [vmem:[%s2995_s5 + $0x68] sm:$0xff] %v282_v13  ;;  %v312_v28 = vld [vmem:[%s2990_s4 + $0x1c0] sm:$0xff]  ;;  %v314_v29 = vld [vmem:[%s2990_s4 + $0x1d0] sm:$0xff] }
  0x30   : > { %285 = vst [vmem:[%s2995_s5 + $0x70] sm:$0xff] %v284_v14  ;;  %v316_v30 = vld [vmem:[%s2990_s4 + $0x1e0] sm:$0xff]  ;;  %v318_v31 = vld [vmem:[%s2990_s4 + $0x1f0] sm:$0xff] }
  0x31   : > { %287 = vst [vmem:[%s2995_s5 + $0x78] sm:$0xff] %v286_v15  ;;  %v320_v32 = vld [vmem:[%s2990_s4 + $0x200] sm:$0xff]  ;;  %v322_v33 = vld [vmem:[%s2990_s4 + $0x210] sm:$0xff] }
  0x32   : > { %289 = vst [vmem:[%s2995_s5 + $0x80] sm:$0xff] %v288_v16  ;;  %v324_v34 = vld [vmem:[%s2990_s4 + $0x220] sm:$0xff]  ;;  %v326_v35 = vld [vmem:[%s2990_s4 + $0x230] sm:$0xff] }
  0x33   : > { %291 = vst [vmem:[%s2995_s5 + $0x88] sm:$0xff] %v290_v17  ;;  %v328_v36 = vld [vmem:[%s2990_s4 + $0x240] sm:$0xff]  ;;  %v330_v37 = vld [vmem:[%s2990_s4 + $0x250] sm:$0xff] }
  0x34   : > { %293 = vst [vmem:[%s2995_s5 + $0x90] sm:$0xff] %v292_v18  ;;  %v332_v38 = vld [vmem:[%s2990_s4 + $0x260] sm:$0xff]  ;;  %v334_v39 = vld [vmem:[%s2990_s4 + $0x270] sm:$0xff] }
  0x35   : > { %295 = vst [vmem:[%s2995_s5 + $0x98] sm:$0xff] %v294_v19 }
  0x36   : > { %297 = vst [vmem:[%s2995_s5 + $0xa0] sm:$0xff] %v296_v20 }
  0x37   : > { %299 = vst [vmem:[%s2995_s5 + $0xa8] sm:$0xff] %v298_v21 }
  0x38   : > { %301 = vst [vmem:[%s2995_s5 + $0xb0] sm:$0xff] %v300_v22 }
  0x39   : > { %303 = vst [vmem:[%s2995_s5 + $0xb8] sm:$0xff] %v302_v23 }
  0x3a   : > { %305 = vst [vmem:[%s2995_s5 + $0xc0] sm:$0xff] %v304_v24 }
  0x3b   : > { %307 = vst [vmem:[%s2995_s5 + $0xc8] sm:$0xff] %v306_v25 }
  0x3c   : > { %309 = vst [vmem:[%s2995_s5 + $0xd0] sm:$0xff] %v308_v26 }
  0x3d   : > { %311 = vst [vmem:[%s2995_s5 + $0xd8] sm:$0xff] %v310_v27 }
  0x3e   : > { %313 = vst [vmem:[%s2995_s5 + $0xe0] sm:$0xff] %v312_v28 }
  0x3f   : > { %315 = vst [vmem:[%s2995_s5 + $0xe8] sm:$0xff] %v314_v29 }
  0x40   : > { %317 = vst [vmem:[%s2995_s5 + $0xf0] sm:$0xff] %v316_v30 }
  0x41   : > { %319 = vst [vmem:[%s2995_s5 + $0xf8] sm:$0xff] %v318_v31 }
  0x42   : > { %321 = vst [vmem:[%s2995_s5 + $0x100] sm:$0xff] %v320_v32 }
  0x43   : > { %323 = vst [vmem:[%s2995_s5 + $0x108] sm:$0xff] %v322_v33 }
  0x44   : > { %325 = vst [vmem:[%s2995_s5 + $0x110] sm:$0xff] %v324_v34 }
  0x45   : > { %327 = vst [vmem:[%s2995_s5 + $0x118] sm:$0xff] %v326_v35 }
  0x46   : > { %329 = vst [vmem:[%s2995_s5 + $0x120] sm:$0xff] %v328_v36 }
  0x47   : > { %331 = vst [vmem:[%s2995_s5 + $0x128] sm:$0xff] %v330_v37 }
  0x48   : > { %333 = vst [vmem:[%s2995_s5 + $0x130] sm:$0xff] %v332_v38 }
  0x49   : > { %335 = vst [vmem:[%s2995_s5 + $0x138] sm:$0xff] %v334_v39 }
  0x4a PF: > { %s3075_s6 = sand.u32 1, %s2893_s14   ;;  %s2648_s7 = smul.u32 2304, %s2897_s15 }
  0x4b   : > { %s2647_s8 = smul.u32 2304, %s3075_s6  ;;  %s343_s26 = scalar_lea.sflag [#allocation5], %s3075_s6 }
  0x4c   : > { %s351_s11 = scalar_lea.hbm %s4273_s1, %s2648_s7  ;;  %s2777_s4 = scalar_lea.hbm %s4273_s1, 4608 }
  0x4d   : > { %s352_s17 = sshll.u32 %s351_s11, 4  ;;  %s346_s19 = scalar_lea.vmem [#allocation4], %s2647_s8  ;;  %s353_s17 = int_to_ptr.hbm [resolvable:$true] %s352_s17 }
  0x4e   : > { %s354_s20 = sshll.u32 %s346_s19, 4  ;;  %s2771_s27 = sshra.s32 %s353_s17, 4  ;;  %s355_s20 = int_to_ptr.vmem [resolvable:$true] %s354_s20  ;;  %s2772_s27 = int_to_ptr.hbm [resolvable:$true] %s2771_s27 }
  0x4f   : > { %s2773_s28 = scalar_lea.hbm %s2772_s27, 2304  ;;  %p2778_p1 = scmp.lt.s32.totalorder %s2772_s27, %s4273_s1 }
  0x50   : > { %p2774_p12 = scmp.ne.s32.totalorder %s2772_s27, %s2773_s28  ;;  %p2779_p2 = scmp.lt.s32.totalorder %s2777_s4, %s2773_s28 }
  0x52   : > { %p2775_p13 = pnand %p2774_p12, %p2963_p5  ;;  %p2780_p3 = por %p2779_p2, %p2778_p1 }
  0x54   : > { %p2776_p0 = pneg %p2775_p13 }
  0x56   : > { %p2781_p4 = pnand %p2780_p3, %p2776_p0 }
  0x58   : > { %2784 = shalt.err (!%p2781_p4)
}
  0x59   : > { %s2899_s7 = smov 256   ;;  %s2900_s8 = smov 16  }
  0x5a   : > { %2651 = dma.hbm_to_vmem [thread:$0]  (%p2963_p5), %s353_s17, 36864, %s355_s20, %s343_s26, %s2899_s7, %s2899_s7, %s2900_s8  }
  0x5b   : > { %s2507_s10 = sshll.u32 %s3075_s6, 1  ;;  %s2508_s11 = sshll.u32 %s2897_s15, 1 }
  0x5c   : > { %s372_s30 = scalar_lea.hbm %s4274_s2, %s2508_s11  ;;  %s368_s27 = scalar_lea.vmem [#allocation7], %s2507_s10 }
  0x5d   : > { %s376_s28 = sshll.u32 %s368_s27, 4  ;;  %s374_s4 = sshll.u32 %s372_s30, 4  ;;  %s377_s28 = int_to_ptr.vmem [resolvable:$true] %s376_s28  ;;  %s375_s4 = int_to_ptr.hbm [resolvable:$true] %s374_s4 }
  0x5e   : > { %s365_s5 = scalar_lea.sflag [#allocation8], %s3075_s6  ;;  %s2799_s9 = sshra.s32 %s375_s4, 4  ;;  %s2800_s9 = int_to_ptr.hbm [resolvable:$true] %s2799_s9 }
  0x5f   : > { %s2801_s0 = scalar_lea.hbm %s2800_s9, 2  ;;  %s2805_s26 = scalar_lea.hbm %s4274_s2, 4 }
  0x60   : > { %p2802_p7 = scmp.ne.s32.totalorder %s2800_s9, %s2801_s0  ;;  %p2806_p13 = scmp.lt.s32.totalorder %s2800_s9, %s4274_s2 }
  0x61   : > { %p2807_p0 = scmp.lt.s32.totalorder %s2805_s26, %s2801_s0 }
  0x62   : > { %p2803_p8 = pnand %p2802_p7, %p2963_p5 }
  0x63   : > { %p2808_p1 = por %p2807_p0, %p2806_p13 }
  0x64   : > { %p2804_p12 = pneg %p2803_p8 }
  0x66   : > { %p2809_p2 = pnand %p2808_p1, %p2804_p12 }
  0x68   : > { %2812 = shalt.err (!%p2809_p2)
}
  0x69   : > { %2652 = dma.hbm_to_vmem [thread:$0]  (%p2963_p5), %s375_s4, 32, %s377_s28, %s365_s5  }
  0x6a PF: > { %p2509_p3 = scmp.ge.s32.totalorder %s2897_s15, 1  ;;  %p381_p4 = scmp.lt.s32.totalorder %s2897_s15, 3 }
  0x6c   : > { %p382_p7 = pnand %p2509_p3, %p381_p4 }
  0x6e   : > { %385 = sbr.rel (%p382_p7) target bundleno = 869 (0x365), region = 66 }
  0x73   : > { %s3112_s6 = sand.u32 1, %s2889_s13  }
  0x74   : > { %s2649_s0 = smul.u32 320, %s3112_s6  ;;  %s395_s22 = scalar_lea.sflag [#allocation5], %s3112_s6 }
  0x75   : > { %s2650_s10 = smul.u32 2304, %s3112_s6 }
  0x76   : > { %s3116_s11 = scalar_lea.vmem [#allocation3], %s2649_s0 }
  0x77   : > { %s3119_s19 = scalar_lea.vmem [#allocation4], %s2650_s10 }
  0x78   : > { %2872 = dma.done.wait (%p2967_p6), %s395_s22, 36864  }
  0x79   : > { %2874 = vsyncadd (%p2967_p6), %s395_s22, 4294930432  ;;  %s2510_s29 = sshll.u32 %s3112_s6, 1  ;;  %s405_s30 = scalar_lea.sflag [#allocation8], %s3112_s6 }
  0x7a   : > { %s3127_s27 = scalar_lea.vmem [#allocation7], %s2510_s29 }
  0x7b   : > { %2876 = dma.done.wait (%p2967_p6), %s405_s30, 32  }
  0x7c   : > { %2878 = vsyncadd (%p2967_p6), %s405_s30, 4294967264  ;;  %v906_v40 = vld [vmem:[%s3119_s19 + $0xf0] sm:$0xff]  ;;  %v904_v41 = vld [vmem:[%s3119_s19 + $0xe0] sm:$0xff]  ;;  %s2511_s23 = sshll.u32 %s3112_s6, 8  ;;  %s2613_s4 = sshll.u32 %s2945_s16, 4 }
  0x7d   : > { %v938_v42 = vld [vmem:[%s3119_s19 + $0x1f0] sm:$0xff]  ;;  %2614 = vmatpush.msra.mxu2 %v906_v40  ;;  %v936_v43 = vld [vmem:[%s3119_s19 + $0x1e0] sm:$0xff]  ;;  %1170 = vmatpush.msra.mxu0 %v906_v40  ;;  %s3832_s28 = scalar_lea.vmem [#allocation9], %s2511_s23  ;;  %s2384_s17 = scalar_lea.hbm %s4275_s3, %s2613_s4 }
  0x7e   : > { %2630 = vmatpush.msra.mxu3 %v938_v42  ;;  %v902_v44 = vld [vmem:[%s3119_s19 + $0xd0] sm:$0xff]  ;;  %1235 = vmatpush.msra.mxu1 %v938_v42  ;;  %v900_v46 = vld [vmem:[%s3119_s19 + $0xc0] sm:$0xff]  ;;  %s2385_s20 = sshll.u32 %s3832_s28, 4  ;;  %s2387_s26 = sshll.u32 %s2384_s17, 4  ;;  %s2386_s20 = int_to_ptr.vmem [resolvable:$true] %s2385_s20  ;;  %s2388_s26 = int_to_ptr.hbm [resolvable:$true] %s2387_s26 }
  0x7f   : > { %v934_v45 = vld [vmem:[%s3119_s19 + $0x1d0] sm:$0xff]  ;;  %2615 = vmatpush.msra.mxu2 %v904_v41  ;;  %v932_v47 = vld [vmem:[%s3119_s19 + $0x1c0] sm:$0xff]  ;;  %1171 = vmatpush.msra.mxu0 %v904_v41  ;;  %s2373_s16 = scalar_lea.sflag [#allocation6], %s3112_s6  ;;  %s2841_s7 = sshra.s32 %s2388_s26, 4  ;;  %s2842_s7 = int_to_ptr.hbm [resolvable:$true] %s2841_s7 }
  0x80   : > { %2631 = vmatpush.msra.mxu3 %v936_v43  ;;  %1236 = vmatpush.msra.mxu1 %v936_v43  ;;  %v898_v48 = vld [vmem:[%s3119_s19 + $0xb0] sm:$0xff]  ;;  %v896_v50 = vld [vmem:[%s3119_s19 + $0xa0] sm:$0xff]  ;;  %s2843_s8 = scalar_lea.hbm %s2842_s7, 256  ;;  %p2848_p12 = scmp.lt.s32.totalorder %s2842_s7, %s4275_s3 }
  0x81   : > { %2616 = vmatpush.msra.mxu2 %v902_v44  ;;  %v930_v49 = vld [vmem:[%s3119_s19 + $0x1b0] sm:$0xff]  ;;  %1172 = vmatpush.msra.mxu0 %v902_v44  ;;  %v928_v51 = vld [vmem:[%s3119_s19 + $0x1a0] sm:$0xff]  ;;  %p2844_p5 = scmp.ne.s32.totalorder %s2842_s7, %s2843_s8 }
  0x82   : > { %2632 = vmatpush.msra.mxu3 %v934_v45  ;;  %1237 = vmatpush.msra.mxu1 %v934_v45  ;;  %v894_v52 = vld [vmem:[%s3119_s19 + $0x90] sm:$0xff]  ;;  %v892_v54 = vld [vmem:[%s3119_s19 + $0x80] sm:$0xff] }
  0x83   : > { %2617 = vmatpush.msra.mxu2 %v900_v46  ;;  %1173 = vmatpush.msra.mxu0 %v900_v46  ;;  %v926_v53 = vld [vmem:[%s3119_s19 + $0x190] sm:$0xff]  ;;  %v924_v55 = vld [vmem:[%s3119_s19 + $0x180] sm:$0xff]  ;;  %p2845_p6 = pnand %p2844_p5, %p2972_p9 }
  0x84   : > { %2633 = vmatpush.msra.mxu3 %v932_v47  ;;  %1238 = vmatpush.msra.mxu1 %v932_v47  ;;  %v890_v56 = vld [vmem:[%s3119_s19 + $0x70] sm:$0xff]  ;;  %v888_v58 = vld [vmem:[%s3119_s19 + $0x60] sm:$0xff] }
  0x85   : > { %2618 = vmatpush.msra.mxu2 %v898_v48  ;;  %1174 = vmatpush.msra.mxu0 %v898_v48  ;;  %v922_v57 = vld [vmem:[%s3119_s19 + $0x170] sm:$0xff]  ;;  %v920_v59 = vld [vmem:[%s3119_s19 + $0x160] sm:$0xff]  ;;  %p2846_p8 = pneg %p2845_p6 }
  0x86   : > { %2634 = vmatpush.msra.mxu3 %v930_v49  ;;  %1239 = vmatpush.msra.mxu1 %v930_v49  ;;  %v886_v60 = vld [vmem:[%s3119_s19 + $0x50] sm:$0xff]  ;;  %v884_v62 = vld [vmem:[%s3119_s19 + $0x40] sm:$0xff] }
  0x87   : > { %2619 = vmatpush.msra.mxu2 %v896_v50  ;;  %1175 = vmatpush.msra.mxu0 %v896_v50  ;;  %v918_v61 = vld [vmem:[%s3119_s19 + $0x150] sm:$0xff]  ;;  %v916_v63 = vld [vmem:[%s3119_s19 + $0x140] sm:$0xff] }
  0x88   : > { %2635 = vmatpush.msra.mxu3 %v928_v51  ;;  %1240 = vmatpush.msra.mxu1 %v928_v51  ;;  %v882_v0 = vld [vmem:[%s3119_s19 + $0x30] sm:$0xff]  ;;  %v880_v2 = vld [vmem:[%s3119_s19 + $0x20] sm:$0xff] }
  0x89   : > { %2620 = vmatpush.msra.mxu2 %v894_v52  ;;  %1176 = vmatpush.msra.mxu0 %v894_v52  ;;  %v914_v1 = vld [vmem:[%s3119_s19 + $0x130] sm:$0xff]  ;;  %v912_v3 = vld [vmem:[%s3119_s19 + $0x120] sm:$0xff] }
  0x8a   : > { %2636 = vmatpush.msra.mxu3 %v926_v53  ;;  %1241 = vmatpush.msra.mxu1 %v926_v53  ;;  %v878_v4 = vld [vmem:[%s3119_s19 + $0x10] sm:$0xff]  ;;  %v876_v6 = vld [vmem:[%s3119_s19] sm:$0xff] }
  0x8b   : > { %2621 = vmatpush.msra.mxu2 %v892_v54  ;;  %1177 = vmatpush.msra.mxu0 %v892_v54  ;;  %v910_v5 = vld [vmem:[%s3119_s19 + $0x110] sm:$0xff]  ;;  %v908_v7 = vld [vmem:[%s3119_s19 + $0x100] sm:$0xff] }
  0x8c   : > { %2637 = vmatpush.msra.mxu3 %v924_v55  ;;  %1242 = vmatpush.msra.mxu1 %v924_v55  ;;  %v450_v8 = vld [vmem:[%s3116_s11 + $0xa0] sm:$0xff]  ;;  %v970_v10 = vld [vmem:[%s3119_s19 + $0x2f0] sm:$0xff] }
  0x8d   : > { %2622 = vmatpush.msra.mxu2 %v890_v56  ;;  %1178 = vmatpush.msra.mxu0 %v890_v56  ;;  %v482_v9 = vld [vmem:[%s3116_s11 + $0xa1] sm:$0xff]  ;;  %v1002_v11 = vld [vmem:[%s3119_s19 + $0x3f0] sm:$0xff] }
  0x8e   : > { %2638 = vmatpush.msra.mxu3 %v922_v57  ;;  %1243 = vmatpush.msra.mxu1 %v922_v57  ;;  %v968_v12 = vld [vmem:[%s3119_s19 + $0x2e0] sm:$0xff]  ;;  %v966_v16 = vld [vmem:[%s3119_s19 + $0x2d0] sm:$0xff] }
  0x8f   : > { %2623 = vmatpush.msra.mxu2 %v888_v58  ;;  %1179 = vmatpush.msra.mxu0 %v888_v58  ;;  %v1000_v13 = vld [vmem:[%s3119_s19 + $0x3e0] sm:$0xff]  ;;  %v998_v17 = vld [vmem:[%s3119_s19 + $0x3d0] sm:$0xff] }
  0x90   : > { %2639 = vmatpush.msra.mxu3 %v920_v59  ;;  %1244 = vmatpush.msra.mxu1 %v920_v59  ;;  %v3172_v14 = vld [vmem:[%s3116_s11] sm:$0xff]  ;;  %v1034_v18 = vld [vmem:[%s3119_s19 + $0x4f0] sm:$0xff] }
  0x91   : > { %2624 = vmatpush.msra.mxu2 %v886_v60  ;;  %1180 = vmatpush.msra.mxu0 %v886_v60  ;;  %v474_v15 = vld [vmem:[%s3116_s11 + $0x1] sm:$0xff]  ;;  %v1066_v19 = vld [vmem:[%s3119_s19 + $0x5f0] sm:$0xff] }
  0x92   : > { %2640 = vmatpush.msra.mxu3 %v918_v61  ;;  %1245 = vmatpush.msra.mxu1 %v918_v61  ;;  %v964_v20 = vld [vmem:[%s3119_s19 + $0x2c0] sm:$0xff]  ;;  %v3183_v22 = vld [vmem:[%s3116_s11 + $0xb0] sm:$0xff] }
  0x93   : > { %2625 = vmatpush.msra.mxu2 %v884_v62  ;;  %1181 = vmatpush.msra.mxu0 %v884_v62  ;;  %v996_v21 = vld [vmem:[%s3119_s19 + $0x3c0] sm:$0xff]  ;;  %v3186_v23 = vld [vmem:[%s3116_s11 + $0xb1] sm:$0xff] }
  0x94   : > { %2641 = vmatpush.msra.mxu3 %v916_v63  ;;  %1246 = vmatpush.msra.mxu1 %v916_v63  ;;  %v1032_v24 = vld [vmem:[%s3119_s19 + $0x4e0] sm:$0xff]  ;;  %v962_v25 = vld [vmem:[%s3119_s19 + $0x2b0] sm:$0xff] }
  0x95   : > { %2626 = vmatpush.msra.mxu2 %v882_v0  ;;  %1182 = vmatpush.msra.mxu0 %v882_v0  ;;  %v1064_v26 = vld [vmem:[%s3119_s19 + $0x5e0] sm:$0xff]  ;;  %v994_v27 = vld [vmem:[%s3119_s19 + $0x3b0] sm:$0xff] }
  0x96   : > { %2642 = vmatpush.msra.mxu3 %v914_v1  ;;  %1247 = vmatpush.msra.mxu1 %v914_v1  ;;  %v1030_v28 = vld [vmem:[%s3119_s19 + $0x4d0] sm:$0xff]  ;;  %v960_v29 = vld [vmem:[%s3119_s19 + $0x2a0] sm:$0xff] }
  0x97   : > { %2627 = vmatpush.msra.mxu2 %v880_v2  ;;  %1183 = vmatpush.msra.mxu0 %v880_v2  ;;  %v3197_v30 = vld [vmem:[%s3116_s11 + $0x10] sm:$0xff]  ;;  %v992_v33 = vld [vmem:[%s3119_s19 + $0x3a0] sm:$0xff] }
  0x98   : > { %2643 = vmatpush.msra.mxu3 %v912_v3  ;;  %1248 = vmatpush.msra.mxu1 %v912_v3  ;;  %v3200_v31 = vld [vmem:[%s3116_s11 + $0x11] sm:$0xff]  ;;  %v1028_v34 = vld [vmem:[%s3119_s19 + $0x4c0] sm:$0xff] }
  0x99   : > { %2628 = vmatpush.msra.mxu2 %v878_v4  ;;  %1184 = vmatpush.msra.mxu0 %v878_v4  ;;  %v1062_v32 = vld [vmem:[%s3119_s19 + $0x5d0] sm:$0xff]  ;;  %v1060_v36 = vld [vmem:[%s3119_s19 + $0x5c0] sm:$0xff] }
  0x9a   : > { %2644 = vmatpush.msra.mxu3 %v910_v5  ;;  %1249 = vmatpush.msra.mxu1 %v910_v5  ;;  %v958_v35 = vld [vmem:[%s3119_s19 + $0x290] sm:$0xff]  ;;  %v3211_v38 = vld [vmem:[%s3116_s11 + $0xc0] sm:$0xff] }
  0x9b   : > { %2629 = vmatpush.msra.mxu2 %v876_v6  ;;  %1185 = vmatpush.msra.mxu0 %v876_v6  ;;  %v990_v37 = vld [vmem:[%s3119_s19 + $0x390] sm:$0xff]  ;;  %v3214_v39 = vld [vmem:[%s3116_s11 + $0xc1] sm:$0xff] }
  0x9c   : > { %2645 = vmatpush.msra.mxu3 %v908_v7  ;;  %1210 = vmatmul.f32.vlgmr.msra.gmra.mxu2 %v450_v8  ;;  %v1026_v40 = vld [vmem:[%s3119_s19 + $0x4b0] sm:$0xff]  ;;  %v956_v41 = vld [vmem:[%s3119_s19 + $0x280] sm:$0xff] }
  0x9d   : > { %1275 = vmatmul.f32.vlgmr.msra.gmra.mxu3 %v482_v9  ;;  %1300 = vmatpush.msrb.mxu2 %v970_v10  ;;  %v1058_v42 = vld [vmem:[%s3119_s19 + $0x5b0] sm:$0xff]  ;;  %v988_v43 = vld [vmem:[%s3119_s19 + $0x380] sm:$0xff] }
  0x9e   : > { %1365 = vmatpush.msrb.mxu3 %v1002_v11  ;;  %1250 = vmatpush.msra.mxu1 %v908_v7  ;;  %v1024_v44 = vld [vmem:[%s3119_s19 + $0x4a0] sm:$0xff]  ;;  %v954_v45 = vld [vmem:[%s3119_s19 + $0x270] sm:$0xff] }
  0x9f   : > { %1301 = vmatpush.msrb.mxu2 %v968_v12  ;;  %1186 = vmatmul.f32.vlgmr.msra.gmra.mxu0 %v3172_v14  ;;  %v3225_v46 = vld [vmem:[%s3116_s11 + $0x20] sm:$0xff]  ;;  %v986_v49 = vld [vmem:[%s3119_s19 + $0x370] sm:$0xff] }
  0xa0   : > { %1366 = vmatpush.msrb.mxu3 %v1000_v13  ;;  %1251 = vmatmul.f32.vlgmr.msra.gmra.mxu1 %v474_v15  ;;  %v3228_v47 = vld [vmem:[%s3116_s11 + $0x21] sm:$0xff]  ;;  %v1022_v50 = vld [vmem:[%s3119_s19 + $0x490] sm:$0xff] }
  0xa1   : > { %1302 = vmatpush.msrb.mxu2 %v966_v16  ;;  %1430 = vmatpush.msrb.mxu0 %v1034_v18  ;;  %v1056_v48 = vld [vmem:[%s3119_s19 + $0x5a0] sm:$0xff]  ;;  %v1054_v52 = vld [vmem:[%s3119_s19 + $0x590] sm:$0xff] }
  0xa2   : > { %1367 = vmatpush.msrb.mxu3 %v998_v17  ;;  %1495 = vmatpush.msrb.mxu1 %v1066_v19  ;;  %v952_v51 = vld [vmem:[%s3119_s19 + $0x260] sm:$0xff]  ;;  %v3239_v54 = vld [vmem:[%s3116_s11 + $0xd0] sm:$0xff] }
  0xa3   : > { %1303 = vmatpush.msrb.mxu2 %v964_v20  ;;  %1431 = vmatpush.msrb.mxu0 %v1032_v24  ;;  %v984_v53 = vld [vmem:[%s3119_s19 + $0x360] sm:$0xff]  ;;  %v3242_v55 = vld [vmem:[%s3116_s11 + $0xd1] sm:$0xff] }
  0xa4   : > { %1368 = vmatpush.msrb.mxu3 %v996_v21  ;;  %1213 = vmatmul.f32.gmra.mxu2 %v3183_v22  ;;  %v1020_v56 = vld [vmem:[%s3119_s19 + $0x480] sm:$0xff]  ;;  %v950_v57 = vld [vmem:[%s3119_s19 + $0x250] sm:$0xff] }
  0xa5   : > { %1278 = vmatmul.f32.gmra.mxu3 %v3186_v23  ;;  %1304 = vmatpush.msrb.mxu2 %v962_v25  ;;  %v1052_v58 = vld [vmem:[%s3119_s19 + $0x580] sm:$0xff]  ;;  %v982_v59 = vld [vmem:[%s3119_s19 + $0x350] sm:$0xff] }
  0xa6   : > { %1496 = vmatpush.msrb.mxu1 %v1064_v26  ;;  %1369 = vmatpush.msrb.mxu3 %v994_v27  ;;  %v1018_v60 = vld [vmem:[%s3119_s19 + $0x470] sm:$0xff]  ;;  %v948_v61 = vld [vmem:[%s3119_s19 + $0x240] sm:$0xff] }
  0xa7   : > { %1432 = vmatpush.msrb.mxu0 %v1030_v28  ;;  %1305 = vmatpush.msrb.mxu2 %v960_v29  ;;  %v3253_v62 = vld [vmem:[%s3116_s11 + $0x30] sm:$0xff]  ;;  %v980_v1 = vld [vmem:[%s3119_s19 + $0x340] sm:$0xff] }
  0xa8   : > { %1189 = vmatmul.f32.gmra.mxu0 %v3197_v30  ;;  %1254 = vmatmul.f32.gmra.mxu1 %v3200_v31  ;;  %v3256_v63 = vld [vmem:[%s3116_s11 + $0x31] sm:$0xff]  ;;  %v1016_v2 = vld [vmem:[%s3119_s19 + $0x460] sm:$0xff] }
  0xa9   : > { %1497 = vmatpush.msrb.mxu1 %v1062_v32  ;;  %1370 = vmatpush.msrb.mxu3 %v992_v33  ;;  %v1050_v0 = vld [vmem:[%s3119_s19 + $0x570] sm:$0xff]  ;;  %v1048_v4 = vld [vmem:[%s3119_s19 + $0x560] sm:$0xff] }
  0xaa   : > { %1433 = vmatpush.msrb.mxu0 %v1028_v34  ;;  %1306 = vmatpush.msrb.mxu2 %v958_v35  ;;  %v946_v3 = vld [vmem:[%s3119_s19 + $0x230] sm:$0xff]  ;;  %v3267_v6 = vld [vmem:[%s3116_s11 + $0xe0] sm:$0xff] }
  0xab   : > { %1498 = vmatpush.msrb.mxu1 %v1060_v36  ;;  %1371 = vmatpush.msrb.mxu3 %v990_v37  ;;  %v978_v5 = vld [vmem:[%s3119_s19 + $0x330] sm:$0xff]  ;;  %v3270_v7 = vld [vmem:[%s3116_s11 + $0xe1] sm:$0xff] }
  0xac   : > { %1216 = vmatmul.f32.gmra.mxu2 %v3211_v38  ;;  %1434 = vmatpush.msrb.mxu0 %v1026_v40  ;;  %v1014_v8 = vld [vmem:[%s3119_s19 + $0x450] sm:$0xff]  ;;  %v944_v9 = vld [vmem:[%s3119_s19 + $0x220] sm:$0xff] }
  0xad   : > { %1281 = vmatmul.f32.gmra.mxu3 %v3214_v39  ;;  %1307 = vmatpush.msrb.mxu2 %v956_v41  ;;  %v1046_v10 = vld [vmem:[%s3119_s19 + $0x550] sm:$0xff]  ;;  %v976_v11 = vld [vmem:[%s3119_s19 + $0x320] sm:$0xff] }
  0xae   : > { %1499 = vmatpush.msrb.mxu1 %v1058_v42  ;;  %1372 = vmatpush.msrb.mxu3 %v988_v43  ;;  %v1012_v12 = vld [vmem:[%s3119_s19 + $0x440] sm:$0xff]  ;;  %v942_v13 = vld [vmem:[%s3119_s19 + $0x210] sm:$0xff] }
  0xaf   : > { %1435 = vmatpush.msrb.mxu0 %v1024_v44  ;;  %1308 = vmatpush.msrb.mxu2 %v954_v45  ;;  %v3281_v15 = vld [vmem:[%s3116_s11 + $0x40] sm:$0xff]  ;;  %v974_v18 = vld [vmem:[%s3119_s19 + $0x310] sm:$0xff]  ;;  %v907_v44 = vld [vmem:[%s3119_s19 + $0xf8] sm:$0xff] }
  0xb0   : > { %1192 = vmatmul.f32.gmra.mxu0 %v3225_v46  ;;  %1257 = vmatmul.f32.gmra.mxu1 %v3228_v47  ;;  %v3284_v16 = vld [vmem:[%s3116_s11 + $0x41] sm:$0xff]  ;;  %v1010_v19 = vld [vmem:[%s3119_s19 + $0x430] sm:$0xff] }
  0xb1   : > { %1500 = vmatpush.msrb.mxu1 %v1056_v48  ;;  %1373 = vmatpush.msrb.mxu3 %v986_v49  ;;  %v1044_v17 = vld [vmem:[%s3119_s19 + $0x540] sm:$0xff]  ;;  %v1042_v21 = vld [vmem:[%s3119_s19 + $0x530] sm:$0xff] }
  0xb2   : > { %1436 = vmatpush.msrb.mxu0 %v1022_v50  ;;  %1309 = vmatpush.msrb.mxu2 %v952_v51  ;;  %v940_v20 = vld [vmem:[%s3119_s19 + $0x200] sm:$0xff]  ;;  %v3295_v25 = vld [vmem:[%s3116_s11 + $0xf0] sm:$0xff] }
  0xb3   : > { %1501 = vmatpush.msrb.mxu1 %v1054_v52  ;;  %1374 = vmatpush.msrb.mxu3 %v984_v53  ;;  %v972_v24 = vld [vmem:[%s3119_s19 + $0x300] sm:$0xff]  ;;  %v3298_v26 = vld [vmem:[%s3116_s11 + $0xf1] sm:$0xff] }
  0xb4   : > { %1219 = vmatmul.f32.gmra.mxu2 %v3239_v54  ;;  %1437 = vmatpush.msrb.mxu0 %v1020_v56  ;;  %v1008_v27 = vld [vmem:[%s3119_s19 + $0x420] sm:$0xff]  ;;  %v1098_v29 = vld [vmem:[%s3119_s19 + $0x6f0] sm:$0xff]  ;;  %v905_v56 = vld [vmem:[%s3119_s19 + $0xe8] sm:$0xff] }
  0xb5   : > { %1284 = vmatmul.f32.gmra.mxu3 %v3242_v55  ;;  %1310 = vmatpush.msrb.mxu2 %v950_v57  ;;  %v1040_v28 = vld [vmem:[%s3119_s19 + $0x520] sm:$0xff]  ;;  %v1130_v32 = vld [vmem:[%s3119_s19 + $0x7f0] sm:$0xff] }
  0xb6   : > { %1502 = vmatpush.msrb.mxu1 %v1052_v58  ;;  %1375 = vmatpush.msrb.mxu3 %v982_v59  ;;  %v1006_v33 = vld [vmem:[%s3119_s19 + $0x410] sm:$0xff]  ;;  %v1004_v37 = vld [vmem:[%s3119_s19 + $0x400] sm:$0xff] }
  0xb7   : > { %1438 = vmatpush.msrb.mxu0 %v1018_v60  ;;  %1311 = vmatpush.msrb.mxu2 %v948_v61  ;;  %v1038_v34 = vld [vmem:[%s3119_s19 + $0x510] sm:$0xff]  ;;  %v1036_v40 = vld [vmem:[%s3119_s19 + $0x500] sm:$0xff] }
  0xb8   : > { %1195 = vmatmul.f32.gmra.mxu0 %v3253_v62  ;;  %1260 = vmatmul.f32.gmra.mxu1 %v3256_v63  ;;  %v3309_v35 = vld [vmem:[%s3116_s11 + $0x50] sm:$0xff]  ;;  %v1096_v41 = vld [vmem:[%s3119_s19 + $0x6e0] sm:$0xff] }
  0xb9   : > { %1503 = vmatpush.msrb.mxu1 %v1050_v0  ;;  %1376 = vmatpush.msrb.mxu3 %v980_v1  ;;  %v3312_v36 = vld [vmem:[%s3116_s11 + $0x51] sm:$0xff]  ;;  %v1128_v42 = vld [vmem:[%s3119_s19 + $0x7e0] sm:$0xff] }
  0xba   : > { %1439 = vmatpush.msrb.mxu0 %v1016_v2  ;;  %1312 = vmatpush.msrb.mxu2 %v946_v3  ;;  %v1162_v43 = vld [vmem:[%s3119_s19 + $0x8f0] sm:$0xff]  ;;  %v3323_v45 = vld [vmem:[%s3116_s11 + $0x100] sm:$0xff]  ;;  %v903_v2 = vld [vmem:[%s3119_s19 + $0xd8] sm:$0xff] }
  0xbb   : > { %1504 = vmatpush.msrb.mxu1 %v1048_v4  ;;  %1377 = vmatpush.msrb.mxu3 %v978_v5  ;;  %v3326_v48 = vld [vmem:[%s3116_s11 + $0x101] sm:$0xff]  ;;  %v1094_v49 = vld [vmem:[%s3119_s19 + $0x6d0] sm:$0xff] }
  0xbc   : > { %1222 = vmatmul.f32.gmra.mxu2 %v3267_v6  ;;  %1440 = vmatpush.msrb.mxu0 %v1014_v8  ;;  %v1126_v50 = vld [vmem:[%s3119_s19 + $0x7d0] sm:$0xff]  ;;  %v1160_v51 = vld [vmem:[%s3119_s19 + $0x8e0] sm:$0xff] }
  0xbd   : > { %1287 = vmatmul.f32.gmra.mxu3 %v3270_v7  ;;  %1313 = vmatpush.msrb.mxu2 %v944_v9  ;;  %v3334_v52 = vld [vmem:[%s3116_s11 + $0x60] sm:$0xff]  ;;  %v3343_v57 = vld [vmem:[%s3116_s11 + $0x110] sm:$0xff]  ;;  %v901_v9 = vld [vmem:[%s3119_s19 + $0xc8] sm:$0xff] }
  0xbe   : > { %1505 = vmatpush.msrb.mxu1 %v1046_v10  ;;  %1378 = vmatpush.msrb.mxu3 %v976_v11  ;;  %v3337_v53 = vld [vmem:[%s3116_s11 + $0x61] sm:$0xff]  ;;  %v3346_v58 = vld [vmem:[%s3116_s11 + $0x111] sm:$0xff] }
  0xbf   : > { %1441 = vmatpush.msrb.mxu0 %v1012_v12  ;;  %1314 = vmatpush.msrb.mxu2 %v942_v13  ;;  %v1092_v59 = vld [vmem:[%s3119_s19 + $0x6c0] sm:$0xff]  ;;  %v1158_v61 = vld [vmem:[%s3119_s19 + $0x8d0] sm:$0xff] }
  0xc0   : > { %1198 = vmatmul.f32.gmra.mxu0 %v3281_v15  ;;  %1263 = vmatmul.f32.gmra.mxu1 %v3284_v16  ;;  %v1124_v60 = vld [vmem:[%s3119_s19 + $0x7c0] sm:$0xff]  ;;  %v3354_v0 = vld [vmem:[%s3116_s11 + $0x70] sm:$0xff] }
  0xc1   : > { %1506 = vmatpush.msrb.mxu1 %v1044_v17  ;;  %1379 = vmatpush.msrb.mxu3 %v974_v18  ;;  %v3357_v1 = vld [vmem:[%s3116_s11 + $0x71] sm:$0xff]  ;;  %v506_v3 = vld [vmem:[%s3116_s11 + $0x2] sm:$0xff] }
  0xc2   : > { %1442 = vmatpush.msrb.mxu0 %v1010_v19  ;;  %1315 = vmatpush.msrb.mxu2 %v940_v20  ;;  %v1090_v4 = vld [vmem:[%s3119_s19 + $0x6b0] sm:$0xff]  ;;  %v1156_v8 = vld [vmem:[%s3119_s19 + $0x8c0] sm:$0xff]  ;;  %v899_v17 = vld [vmem:[%s3119_s19 + $0xb8] sm:$0xff] }
  0xc3   : > { %1507 = vmatpush.msrb.mxu1 %v1042_v21  ;;  %1380 = vmatpush.msrb.mxu3 %v972_v24  ;;  %v1122_v5 = vld [vmem:[%s3119_s19 + $0x7b0] sm:$0xff]  ;;  %v1088_v11 = vld [vmem:[%s3119_s19 + $0x6a0] sm:$0xff]  ;;  %v897_v21 = vld [vmem:[%s3119_s19 + $0xa8] sm:$0xff] }
  0xc4   : > { %1225 = vmatmul.f32.gmra.mxu2 %v3295_v25  ;;  %1443 = vmatpush.msrb.mxu0 %v1008_v27  ;;  %v507_v10 = vld [vmem:[%s3116_s11 + $0x12] sm:$0xff]  ;;  %v1120_v12 = vld [vmem:[%s3119_s19 + $0x7a0] sm:$0xff] }
  0xc5   : > { %1290 = vmatmul.f32.gmra.mxu3 %v3298_v26  ;;  %1508 = vmatpush.msrb.mxu1 %v1040_v28  ;;  %v1154_v13 = vld [vmem:[%s3119_s19 + $0x8b0] sm:$0xff]  ;;  %v3376_v18 = vld [vmem:[%s3116_s11 + $0x22] sm:$0xff] }
  0xc6   : > { %1560 = vmatpush.msra.mxu2 %v1098_v29  ;;  %1625 = vmatpush.msra.mxu3 %v1130_v32  ;;  %v1118_v19 = vld [vmem:[%s3119_s19 + $0x790] sm:$0xff]  ;;  %v1152_v20 = vld [vmem:[%s3119_s19 + $0x8a0] sm:$0xff]  ;;  %v895_v32 = vld [vmem:[%s3119_s19 + $0x98] sm:$0xff] }
  0xc7   : > { %1444 = vmatpush.msrb.mxu0 %v1006_v33  ;;  %1509 = vmatpush.msrb.mxu1 %v1038_v34  ;;  %v3387_v24 = vld [vmem:[%s3116_s11 + $0x32] sm:$0xff]  ;;  %v1084_v27 = vld [vmem:[%s3119_s19 + $0x680] sm:$0xff] }
  0xc8   : > { %1201 = vmatmul.f32.gmra.mxu0 %v3309_v35  ;;  %1266 = vmatmul.f32.gmra.mxu1 %v3312_v36  ;;  %v1116_v28 = vld [vmem:[%s3119_s19 + $0x780] sm:$0xff]  ;;  %v1150_v29 = vld [vmem:[%s3119_s19 + $0x890] sm:$0xff] }
  0xc9   : > { %1445 = vmatpush.msrb.mxu0 %v1004_v37  ;;  %1510 = vmatpush.msrb.mxu1 %v1036_v40  ;;  %v3398_v33 = vld [vmem:[%s3116_s11 + $0x42] sm:$0xff]  ;;  %v1082_v34 = vld [vmem:[%s3119_s19 + $0x670] sm:$0xff] }
  0xca   : > { %1561 = vmatpush.msra.mxu2 %v1096_v41  ;;  %1626 = vmatpush.msra.mxu3 %v1128_v42  ;;  %v1114_v37 = vld [vmem:[%s3119_s19 + $0x770] sm:$0xff]  ;;  %v1148_v40 = vld [vmem:[%s3119_s19 + $0x880] sm:$0xff]  ;;  %v893_v42 = vld [vmem:[%s3119_s19 + $0x88] sm:$0xff] }
  0xcb   : > { %1690 = vmatpush.msra.mxu0 %v1162_v43  ;;  %1755 = vmatpush.msra.mxu1 %v907_v44  ;;  %v3408_v41 = vld [vmem:[%s3116_s11 + $0x52] sm:$0xff]  ;;  %v1080_v43 = vld [vmem:[%s3119_s19 + $0x660] sm:$0xff] }
  0xcc   : > { %1228 = vmatmul.f32.gmra.mxu2 %v3323_v45  ;;  %1627 = vmatpush.msra.mxu3 %v1126_v50  ;;  %v1112_v44 = vld [vmem:[%s3119_s19 + $0x760] sm:$0xff] }
  0xcd   : > { %1293 = vmatmul.f32.gmra.mxu3 %v3326_v48  ;;  %1562 = vmatpush.msra.mxu2 %v1094_v49  ;;  %v1146_v49 = vld [vmem:[%s3119_s19 + $0x870] sm:$0xff]  ;;  %v3419_v50 = vld [vmem:[%s3116_s11 + $0x62] sm:$0xff] }
  0xce   : > { %1691 = vmatpush.msra.mxu0 %v1160_v51  ;;  %1756 = vmatpush.msra.mxu1 %v905_v56  ;;  %v891_v51 = vld [vmem:[%s3119_s19 + $0x78] sm:$0xff]  ;;  %v1078_v56 = vld [vmem:[%s3119_s19 + $0x650] sm:$0xff] }
  0xcf   : > { %1563 = vmatpush.msra.mxu2 %v1092_v59  ;;  %1628 = vmatpush.msra.mxu3 %v1124_v60  ;;  %v1110_v59 = vld [vmem:[%s3119_s19 + $0x750] sm:$0xff]  ;;  %v1144_v60 = vld [vmem:[%s3119_s19 + $0x860] sm:$0xff] }
  0xd0   : > { %1204 = vmatmul.f32.gmra.mxu0 %v3334_v52  ;;  %1269 = vmatmul.f32.gmra.mxu1 %v3337_v53 }
  0xd1   : > { %1692 = vmatpush.msra.mxu0 %v1158_v61  ;;  %1757 = vmatpush.msra.mxu1 %v903_v2  ;;  %v3430_v61 = vld [vmem:[%s3116_s11 + $0x72] sm:$0xff]  ;;  %v889_v2 = vld [vmem:[%s3119_s19 + $0x68] sm:$0xff] }
  0xd2   : > { %1564 = vmatpush.msra.mxu2 %v1090_v4  ;;  %1629 = vmatpush.msra.mxu3 %v1122_v5  ;;  %v1076_v4 = vld [vmem:[%s3119_s19 + $0x640] sm:$0xff] }
  0xd3   : > { %1693 = vmatpush.msra.mxu0 %v1156_v8  ;;  %1758 = vmatpush.msra.mxu1 %v901_v9  ;;  %v1108_v5 = vld [vmem:[%s3119_s19 + $0x740] sm:$0xff]  ;;  %v1142_v8 = vld [vmem:[%s3119_s19 + $0x850] sm:$0xff] }
  0xd4   : > { %1231 = vmatmul.f32.gmra.mxu2 %v3343_v57  ;;  %1630 = vmatpush.msra.mxu3 %v1120_v12  ;;  %v3444_v9 = vld [vmem:[%s3116_s11 + $0x81] sm:$0xff] }
  0xd5   : > { %1296 = vmatmul.f32.gmra.mxu3 %v3346_v58  ;;  %1565 = vmatpush.msra.mxu2 %v1088_v11  ;;  %v887_v11 = vld [vmem:[%s3119_s19 + $0x58] sm:$0xff]  ;;  %v514_v12 = vld [vmem:[%s3116_s11 + $0xa2] sm:$0xff] }
  0xd6   : > { %1694 = vmatpush.msra.mxu0 %v1154_v13  ;;  %1759 = vmatpush.msra.mxu1 %v899_v17  ;;  %v1164_v13 = vld [vmem:[%s3127_s27] sm:$0x3] }
  0xd7   : > { %1631 = vmatpush.msra.mxu3 %v1118_v19  ;;  %v3455_v17 = vperm.slane %v1164_v13, 0  ;;  %v1106_v19 = vld [vmem:[%s3119_s19 + $0x730] sm:$0xff] }
  0xd8   : > { %1207 = vmatmul.f32.gmra.mxu0 %v3354_v0  ;;  %1272 = vmatmul.f32.gmra.mxu1 %v3357_v1  ;;  %v3497_v13 = vld [vmem:[%s3116_s11 + $0xd2] sm:$0xff] }
  0xd9   : > { %1695 = vmatpush.msra.mxu0 %v1152_v20  ;;  %1760 = vmatpush.msra.mxu1 %v897_v21  ;;  %v1140_v20 = vld [vmem:[%s3119_s19 + $0x840] sm:$0xff] }
  0xda   : > { %1632 = vmatpush.msra.mxu3 %v1116_v28 }
  0xdb   : > { %1696 = vmatpush.msra.mxu0 %v1150_v29  ;;  %1761 = vmatpush.msra.mxu1 %v895_v32  ;;  %v515_v32 = vld [vmem:[%s3116_s11 + $0xb2] sm:$0xff] }
  0xdc   : > { %1316 = vmatmul.f32.vlgmr.msrb.gmra.mxu2 %v506_v3  ;;  %1633 = vmatpush.msra.mxu3 %v1114_v37  ;;  %v3436_v3 = vld [vmem:[%s3116_s11 + $0x80] sm:$0xff] }
  0xdd   : > { %1381 = vmatmul.f32.vlgmr.msrb.gmra.mxu3 %v3197_v30  ;;  %1697 = vmatpush.msra.mxu0 %v1148_v40  ;;  %v1072_v40 = vld [vmem:[%s3119_s19 + $0x620] sm:$0xff] }
  0xde   : > { %1762 = vmatpush.msra.mxu1 %v893_v42  ;;  %1634 = vmatpush.msra.mxu3 %v1112_v44  ;;  %v1104_v42 = vld [vmem:[%s3119_s19 + $0x720] sm:$0xff] }
  0xdf   : > { %1698 = vmatpush.msra.mxu0 %v1146_v49 }
  0xe0   : > { %1446 = vmatmul.f32.vlgmr.msrb.gmra.mxu0 %v3200_v31  ;;  %1511 = vmatmul.f32.vlgmr.msrb.gmra.mxu1 %v507_v10  ;;  %v1086_v31 = vld [vmem:[%s3119_s19 + $0x690] sm:$0xff] }
  0xe1   : > { %1566 = vmatpush.msra.mxu2 %v1086_v31  ;;  %1763 = vmatpush.msra.mxu1 %v891_v51  ;;  %v1074_v31 = vld [vmem:[%s3119_s19 + $0x630] sm:$0xff] }
  0xe2   : > { %1635 = vmatpush.msra.mxu3 %v1110_v59  ;;  %1699 = vmatpush.msra.mxu0 %v1144_v60 }
  0xe3   : > { %1567 = vmatpush.msra.mxu2 %v1084_v27  ;;  %1764 = vmatpush.msra.mxu1 %v889_v2  ;;  %v1070_v2 = vld [vmem:[%s3119_s19 + $0x610] sm:$0xff] }
  0xe4   : > { %1319 = vmatmul.f32.gmra.mxu2 %v507_v10  ;;  %v3447_v10 = vld [vmem:[%s3116_s11 + $0x82] sm:$0xff]  ;;  %1636 = vmatpush.msra.mxu3 %v1108_v5 }
  0xe5   : > { %1384 = vmatmul.f32.gmra.mxu3 %v3225_v46  ;;  %1568 = vmatpush.msra.mxu2 %v1082_v34  ;;  %v885_v34 = vld [vmem:[%s3119_s19 + $0x48] sm:$0xff]  ;;  %v1136_v5 = vld [vmem:[%s3119_s19 + $0x820] sm:$0xff] }
  0xe6   : > { %1700 = vmatpush.msra.mxu0 %v1142_v8  ;;  %1765 = vmatpush.msra.mxu1 %v887_v11 }
  0xe7   : > { %1569 = vmatpush.msra.mxu2 %v1080_v43  ;;  %1637 = vmatpush.msra.mxu3 %v1106_v19  ;;  %v1138_v43 = vld [vmem:[%s3119_s19 + $0x830] sm:$0xff] }
  0xe8   : > { %1449 = vmatmul.f32.gmra.mxu0 %v3228_v47  ;;  %1514 = vmatmul.f32.gmra.mxu1 %v3376_v18 }
  0xe9   : > { %1570 = vmatpush.msra.mxu2 %v1078_v56  ;;  %1701 = vmatpush.msra.mxu0 %v1140_v20  ;;  %v3479_v56 = vld [vmem:[%s3116_s11 + $0xc2] sm:$0xff] }
  0xea   : > { %1766 = vmatpush.msra.mxu1 %v885_v34  ;;  %1638 = vmatpush.msra.mxu3 %v1104_v42  ;;  %v1068_v20 = vld [vmem:[%s3119_s19 + $0x600] sm:$0xff] }
  0xeb   : > { %1571 = vmatpush.msra.mxu2 %v1076_v4  ;;  %1702 = vmatpush.msra.mxu0 %v1138_v43  ;;  %v1102_v4 = vld [vmem:[%s3119_s19 + $0x710] sm:$0xff] }
  0xec   : > { %1322 = vmatmul.f32.gmra.mxu2 %v3376_v18  ;;  %1639 = vmatpush.msra.mxu3 %v1102_v4 }
  0xed   : > { %1387 = vmatmul.f32.gmra.mxu3 %v3253_v62  ;;  %1572 = vmatpush.msra.mxu2 %v1074_v31 }
  0xee   : > { %1703 = vmatpush.msra.mxu0 %v1136_v5  ;;  %v3533_v5 = vld [vmem:[%s3116_s11 + $0xf2] sm:$0xff] }
  0xef   : > { %1573 = vmatpush.msra.mxu2 %v1072_v40  ;;  %v3515_v40 = vld [vmem:[%s3116_s11 + $0xe2] sm:$0xff] }
  0xf0   : > { %1452 = vmatmul.f32.gmra.mxu0 %v3256_v63  ;;  %1517 = vmatmul.f32.gmra.mxu1 %v3387_v24 }
  0xf1   : > { %1574 = vmatpush.msra.mxu2 %v1070_v2 }
  0xf3   : > { %1575 = vmatpush.msra.mxu2 %v1068_v20 }
  0xf4   : > { %1325 = vmatmul.f32.gmra.mxu2 %v3387_v24 }
  0xf5   : > { %1390 = vmatmul.f32.gmra.mxu3 %v3281_v15 }
  0xf8   : > { %1455 = vmatmul.f32.gmra.mxu0 %v3284_v16  ;;  %1520 = vmatmul.f32.gmra.mxu1 %v3398_v33 }
  0xfc   : > { %1328 = vmatmul.f32.gmra.mxu2 %v3398_v33 }
  0xfd   : > { %1393 = vmatmul.f32.gmra.mxu3 %v3309_v35 }
 0x100   : > { %1458 = vmatmul.f32.gmra.mxu0 %v3312_v36  ;;  %1523 = vmatmul.f32.gmra.mxu1 %v3408_v41 }
 0x104   : > { %1331 = vmatmul.f32.gmra.mxu2 %v3408_v41 }
 0x105   : > { %1396 = vmatmul.f32.gmra.mxu3 %v3334_v52 }
 0x108   : > { %1461 = vmatmul.f32.gmra.mxu0 %v3337_v53  ;;  %1526 = vmatmul.f32.gmra.mxu1 %v3419_v50 }
 0x10c   : > { %1334 = vmatmul.f32.gmra.mxu2 %v3419_v50 }
 0x10d   : > { %1399 = vmatmul.f32.gmra.mxu3 %v3354_v0 }
 0x110   : > { %1464 = vmatmul.f32.gmra.mxu0 %v3357_v1  ;;  %1529 = vmatmul.f32.gmra.mxu1 %v3430_v61 }
 0x114   : > { %1337 = vmatmul.f32.gmra.mxu2 %v3430_v61 }
 0x115   : > { %1402 = vmatmul.f32.gmra.mxu3 %v3436_v3 }
 0x118   : > { %1467 = vmatmul.f32.gmra.mxu0 %v3444_v9  ;;  %1532 = vmatmul.f32.gmra.mxu1 %v3447_v10 }
 0x11c   : > { %1340 = vmatmul.f32.gmra.mxu2 %v514_v12  ;;  %v3460_v21 = vpop.f32.mrf.mxu0 }
 0x11d   : > { %1405 = vmatmul.f32.gmra.mxu3 %v3183_v22  ;;  %v3462_v27 = vpop.f32.mrf.mxu1 }
 0x11f   : > { %v1211_v28 = vpop.f32.mrf.mxu2 }
 0x120   : > { %v1276_v29 = vpop.f32.mrf.mxu3  ;;  %v1212_v22 = vadd.f32 %v1211_v28, %v3455_v17  ;;  %1470 = vmatmul.f32.gmra.mxu0 %v3186_v23  ;;  %1535 = vmatmul.f32.gmra.mxu1 %v515_v32  ;;  %v1100_v28 = vld [vmem:[%s3119_s19 + $0x700] sm:$0xff] }
 0x121   : > { %1640 = vmatpush.msra.mxu3 %v1100_v28  ;;  %v969_v28 = vld [vmem:[%s3119_s19 + $0x2e8] sm:$0xff] }
 0x122   : > { %v3468_v37 = vadd.f32 %v1276_v29, %v1212_v22 }
 0x124   : > { %1343 = vmatmul.f32.gmra.mxu2 %v515_v32 }
 0x125   : > { %1408 = vmatmul.f32.gmra.mxu3 %v3211_v38  ;;  %v3474_v44 = vpop.f32.mrf.mxu0  ;;  %v3476_v49 = vpop.f32.mrf.mxu1  ;;  %v883_v38 = vld [vmem:[%s3119_s19 + $0x38] sm:$0xff] }
 0x126   : > { %1767 = vmatpush.msra.mxu1 %v883_v38 }
 0x127   : > { %v1214_v23 = vpop.f32.mrf.mxu2 }
 0x128   : > { %v1279_v51 = vpop.f32.mrf.mxu3  ;;  %v1215_v59 = vadd.f32 %v1214_v23, %v3455_v17  ;;  %1473 = vmatmul.f32.gmra.mxu0 %v3214_v39  ;;  %1538 = vmatmul.f32.gmra.mxu1 %v3479_v56  ;;  %v939_v23 = vld [vmem:[%s3119_s19 + $0x1f8] sm:$0xff] }
 0x129   : > { %1820 = vmatpush.msrb.mxu2 %v939_v23  ;;  %v935_v23 = vld [vmem:[%s3119_s19 + $0x1d8] sm:$0xff] }
 0x12a   : > { %v3485_v60 = vadd.f32 %v1279_v51, %v1215_v59  ;;  %v1132_v51 = vld [vmem:[%s3119_s19 + $0x800] sm:$0xff] }
 0x12c   : > { %1346 = vmatmul.f32.gmra.mxu2 %v3479_v56 }
 0x12d   : > { %1411 = vmatmul.f32.gmra.mxu3 %v3239_v54  ;;  %v3492_v8 = vpop.f32.mrf.mxu0  ;;  %v3494_v11 = vpop.f32.mrf.mxu1  ;;  %v881_v54 = vld [vmem:[%s3119_s19 + $0x28] sm:$0xff] }
 0x12e   : > { %1768 = vmatpush.msra.mxu1 %v881_v54 }
 0x12f   : > { %v1217_v39 = vpop.f32.mrf.mxu2 }
 0x130   : > { %v1282_v12 = vpop.f32.mrf.mxu3  ;;  %v1218_v31 = vadd.f32 %v1217_v39, %v3455_v17  ;;  %1476 = vmatmul.f32.gmra.mxu0 %v3242_v55  ;;  %1541 = vmatmul.f32.gmra.mxu1 %v3497_v13  ;;  %v1134_v55 = vld [vmem:[%s3119_s19 + $0x810] sm:$0xff] }
 0x131   : > { %1704 = vmatpush.msra.mxu0 %v1134_v55 }
 0x132   : > { %v3503_v19 = vadd.f32 %v1282_v12, %v1218_v31  ;;  %v937_v31 = vld [vmem:[%s3119_s19 + $0x1e8] sm:$0xff] }
 0x133   : > { %1705 = vmatpush.msra.mxu0 %v1132_v51  ;;  %1821 = vmatpush.msrb.mxu2 %v937_v31  ;;  %v1033_v31 = vld [vmem:[%s3119_s19 + $0x4e8] sm:$0xff] }
 0x134   : > { %1349 = vmatmul.f32.gmra.mxu2 %v3497_v13 }
 0x135   : > { %1414 = vmatmul.f32.gmra.mxu3 %v3267_v6  ;;  %v3509_v29 = vpop.f32.mrf.mxu0  ;;  %v3511_v32 = vpop.f32.mrf.mxu1  ;;  %v879_v6 = vld [vmem:[%s3119_s19 + $0x18] sm:$0xff]  ;;  %1822 = vmatpush.msrb.mxu2 %v935_v23  ;;  %v965_v23 = vld [vmem:[%s3119_s19 + $0x2c8] sm:$0xff] }
 0x136   : > { %1769 = vmatpush.msra.mxu1 %v879_v6 }
 0x137   : > { %v1220_v22 = vpop.f32.mrf.mxu2 }
 0x138   : > { %v1285_v34 = vpop.f32.mrf.mxu3  ;;  %v1221_v42 = vadd.f32 %v1220_v22, %v3455_v17  ;;  %1479 = vmatmul.f32.gmra.mxu0 %v3270_v7  ;;  %1544 = vmatmul.f32.gmra.mxu1 %v3515_v40  ;;  %v971_v7 = vld [vmem:[%s3119_s19 + $0x2f8] sm:$0xff] }
 0x139   : > { %1885 = vmatpush.msrb.mxu3 %v971_v7 }
 0x13a   : > { %v3521_v43 = vadd.f32 %v1285_v34, %v1221_v42  ;;  %v3551_v34 = vld [vmem:[%s3116_s11 + $0x102] sm:$0xff] }
 0x13b   : > { %1886 = vmatpush.msrb.mxu3 %v969_v28  ;;  %v3576_v28 = vld [vmem:[%s3116_s11 + $0x120] sm:$0xff] }
 0x13c   : > { %1352 = vmatmul.f32.gmra.mxu2 %v3515_v40  ;;  %4285 = vst [vmem:[#allocation13_spill] sm:$0xff] %v3576_v28 }
 0x13d   : > { %1417 = vmatmul.f32.gmra.mxu3 %v3295_v25  ;;  %v3527_v59 = vpop.f32.mrf.mxu0  ;;  %v3529_v38 = vpop.f32.mrf.mxu1  ;;  %v877_v25 = vld [vmem:[%s3119_s19 + $0x8] sm:$0xff] }
 0x13e   : > { %1770 = vmatpush.msra.mxu1 %v877_v25  ;;  %v3569_v25 = vld [vmem:[%s3116_s11 + $0x112] sm:$0xff] }
 0x13f   : > { %v1223_v2 = vpop.f32.mrf.mxu2 }
 0x140   : > { %v1288_v4 = vpop.f32.mrf.mxu3  ;;  %v1224_v39 = vadd.f32 %v1223_v2, %v3455_v17  ;;  %1482 = vmatmul.f32.gmra.mxu0 %v3298_v26  ;;  %1547 = vmatmul.f32.gmra.mxu1 %v3533_v5  ;;  %v1003_v26 = vld [vmem:[%s3119_s19 + $0x3f8] sm:$0xff] }
 0x141   : > { %1950 = vmatpush.msrb.mxu0 %v1003_v26  ;;  %v967_v2 = vld [vmem:[%s3119_s19 + $0x2d8] sm:$0xff] }
 0x142   : > { %v3539_v12 = vadd.f32 %v1288_v4, %v1224_v39  ;;  %1887 = vmatpush.msrb.mxu3 %v967_v2  ;;  %v999_v2 = vld [vmem:[%s3119_s19 + $0x3d8] sm:$0xff] }
 0x144   : > { %1355 = vmatmul.f32.gmra.mxu2 %v3533_v5  ;;  %1888 = vmatpush.msrb.mxu3 %v965_v23  ;;  %v931_v23 = vld [vmem:[%s3119_s19 + $0x1b8] sm:$0xff] }
 0x145   : > { %1420 = vmatmul.f32.gmra.mxu3 %v3323_v45  ;;  %v3544_v54 = vpop.f32.mrf.mxu0  ;;  %v3546_v20 = vpop.f32.mrf.mxu1  ;;  %v1035_v45 = vld [vmem:[%s3119_s19 + $0x4f8] sm:$0xff] }
 0x146   : > { %2015 = vmatpush.msrb.mxu1 %v1035_v45  ;;  %v3588_v45 = vld [vmem:[%s3116_s11 + $0x121] sm:$0xff] }
 0x147   : > { %v1226_v55 = vpop.f32.mrf.mxu2  ;;  %4287 = vst [vmem:[#allocation15_spill] sm:$0xff] %v3588_v45 }
 0x148   : > { %v1291_v22 = vpop.f32.mrf.mxu3  ;;  %v1227_v42 = vadd.f32 %v1226_v55, %v3455_v17  ;;  %1485 = vmatmul.f32.gmra.mxu0 %v3326_v48  ;;  %1550 = vmatmul.f32.gmra.mxu1 %v3551_v34  ;;  %v1001_v48 = vld [vmem:[%s3119_s19 + $0x3e8] sm:$0xff] }
 0x149   : > { %1951 = vmatpush.msrb.mxu0 %v1001_v48  ;;  %2016 = vmatpush.msrb.mxu1 %v1033_v31  ;;  %v933_v55 = vld [vmem:[%s3119_s19 + $0x1c8] sm:$0xff]  ;;  %v1188_v31 = vadd.f32 %v3460_v21, %v3455_v17 }
 0x14a   : > { %v3557_v6 = vadd.f32 %v1291_v22, %v1227_v42  ;;  %1823 = vmatpush.msrb.mxu2 %v933_v55 }
 0x14b   : > { %1952 = vmatpush.msrb.mxu0 %v999_v2 }
 0x14c   : > { %1358 = vmatmul.f32.gmra.mxu2 %v3551_v34 }
 0x14d   : > { %1423 = vmatmul.f32.gmra.mxu3 %v3343_v57  ;;  %v3562_v51 = vpop.f32.mrf.mxu0  ;;  %v3564_v7 = vpop.f32.mrf.mxu1  ;;  %1824 = vmatpush.msrb.mxu2 %v931_v23 }
 0x14f   : > { %v1229_v4 = vpop.f32.mrf.mxu2 }
 0x150   : > { %v1294_v39 = vpop.f32.mrf.mxu3  ;;  %v1230_v57 = vadd.f32 %v1229_v4, %v3455_v17  ;;  %1488 = vmatmul.f32.gmra.mxu0 %v3346_v58  ;;  %1553 = vmatmul.f32.gmra.mxu1 %v3569_v25  ;;  %v3591_v58 = vld [vmem:[%s3116_s11 + $0x122] sm:$0xff] }
 0x151   : > { %4288 = vst [vmem:[#allocation16_spill] sm:$0xff] %v3591_v58 }
 0x152   : > { %v3578_v26 = vadd.f32 %v1294_v39, %v1230_v57  ;;  %v1031_v57 = vld [vmem:[%s3119_s19 + $0x4d8] sm:$0xff] }
 0x153   : > { %2017 = vmatpush.msrb.mxu1 %v1031_v57 }
 0x154   : > { %4286 = vst [vmem:[#allocation14_spill] sm:$0xff] %v3578_v26  ;;  %1361 = vmatmul.f32.gmra.mxu2 %v3569_v25 }
 0x155   : > { %1426 = vmatmul.f32.gmra.mxu3 %v3576_v28  ;;  %v3583_v22 = vpop.f32.mrf.mxu0  ;;  %v3585_v42 = vpop.f32.mrf.mxu1 }
 0x157   : > { %v1232_v48 = vpop.f32.mrf.mxu2 }
 0x158   : > { %v1297_v4 = vpop.f32.mrf.mxu3  ;;  %v1233_v39 = vadd.f32 %v1232_v48, %v3455_v17  ;;  %1491 = vmatmul.f32.gmra.mxu0 %v3588_v45  ;;  %1556 = vmatmul.f32.gmra.mxu1 %v3591_v58  ;;  %v1253_v48 = vadd.f32 %v3462_v27, %v1188_v31  ;;  %v963_v45 = vld [vmem:[%s3119_s19 + $0x2b8] sm:$0xff]  ;;  %v997_v58 = vld [vmem:[%s3119_s19 + $0x3c8] sm:$0xff] }
 0x159   : > { %1889 = vmatpush.msrb.mxu3 %v963_v45  ;;  %1953 = vmatpush.msrb.mxu0 %v997_v58  ;;  %v929_v45 = vld [vmem:[%s3119_s19 + $0x1a8] sm:$0xff] }
 0x15a   : > { %v3601_v55 = vadd.f32 %v1297_v4, %v1233_v39  ;;  %v1191_v4 = vadd.f32 %v3474_v44, %v3455_v17  ;;  %1825 = vmatpush.msrb.mxu2 %v929_v45 }
 0x15c   : > { %1576 = vmatmul.f32.vlgmr.msra.gmra.mxu2 %v3225_v46 }
 0x15d   : > { %1641 = vmatmul.f32.vlgmr.msra.gmra.mxu3 %v3228_v47  ;;  %v1447_v2 = vpop.f32.mrf.mxu0  ;;  %v1512_v26 = vpop.f32.mrf.mxu1  ;;  %v1029_v47 = vld [vmem:[%s3119_s19 + $0x4c8] sm:$0xff] }
 0x15e   : > { %2018 = vmatpush.msrb.mxu1 %v1029_v47 }
 0x15f   : > { %v1317_v57 = vpop.f32.mrf.mxu2 }
 0x160   : > { %v1382_v28 = vpop.f32.mrf.mxu3  ;;  %v1318_v21 = vadd.f32 %v1317_v57, %v1253_v48  ;;  %1706 = vmatmul.f32.vlgmr.msra.gmra.mxu0 %v3376_v18  ;;  %1771 = vmatmul.f32.vlgmr.msra.gmra.mxu1 %v3172_v14  ;;  %v1256_v18 = vadd.f32 %v3476_v49, %v1191_v4  ;;  %v961_v14 = vld [vmem:[%s3119_s19 + $0x2a8] sm:$0xff]  ;;  %v995_v48 = vld [vmem:[%s3119_s19 + $0x3b8] sm:$0xff]  ;;  %v1194_v49 = vadd.f32 %v3492_v8, %v3455_v17 }
 0x161   : > { %1890 = vmatpush.msrb.mxu3 %v961_v14  ;;  %1954 = vmatpush.msrb.mxu0 %v995_v48  ;;  %v925_v14 = vld [vmem:[%s3119_s19 + $0x188] sm:$0xff] }
 0x162   : > { %v1383_v27 = vadd.f32 %v1382_v28, %v1318_v21  ;;  %v927_v21 = vld [vmem:[%s3119_s19 + $0x198] sm:$0xff] }
 0x163   : > { %1826 = vmatpush.msrb.mxu2 %v927_v21  ;;  %v923_v21 = vld [vmem:[%s3119_s19 + $0x178] sm:$0xff] }
 0x164   : > { %v1448_v39 = vadd.f32 %v1447_v2, %v1383_v27  ;;  %1579 = vmatmul.f32.gmra.mxu2 %v3253_v62 }
 0x165   : > { %1644 = vmatmul.f32.gmra.mxu3 %v3256_v63  ;;  %v1450_v58 = vpop.f32.mrf.mxu0  ;;  %v1515_v31 = vpop.f32.mrf.mxu1  ;;  %v1027_v63 = vld [vmem:[%s3119_s19 + $0x4b8] sm:$0xff]  ;;  %1827 = vmatpush.msrb.mxu2 %v925_v14 }
 0x166   : > { %v3618_v23 = vadd.f32 %v1512_v26, %v1448_v39  ;;  %2019 = vmatpush.msrb.mxu1 %v1027_v63  ;;  %v993_v39 = vld [vmem:[%s3119_s19 + $0x3a8] sm:$0xff]  ;;  %v987_v14 = vld [vmem:[%s3119_s19 + $0x378] sm:$0xff] }
 0x167   : > { %v1320_v57 = vpop.f32.mrf.mxu2  ;;  %1955 = vmatpush.msrb.mxu0 %v993_v39  ;;  %1828 = vmatpush.msrb.mxu2 %v923_v21 }
 0x168   : > { %v1385_v44 = vpop.f32.mrf.mxu3  ;;  %v1321_v28 = vadd.f32 %v1320_v57, %v1256_v18  ;;  %1709 = vmatmul.f32.gmra.mxu0 %v3387_v24  ;;  %1774 = vmatmul.f32.gmra.mxu1 %v3197_v30  ;;  %v1259_v24 = vadd.f32 %v3494_v11, %v1194_v49  ;;  %v959_v30 = vld [vmem:[%s3119_s19 + $0x298] sm:$0xff]  ;;  %v1197_v11 = vadd.f32 %v3509_v29, %v3455_v17 }
 0x169   : > { %1891 = vmatpush.msrb.mxu3 %v959_v30  ;;  %v989_v30 = vld [vmem:[%s3119_s19 + $0x388] sm:$0xff] }
 0x16a   : > { %v1386_v26 = vadd.f32 %v1385_v44, %v1321_v28  ;;  %v991_v28 = vld [vmem:[%s3119_s19 + $0x398] sm:$0xff] }
 0x16b   : > { %1956 = vmatpush.msrb.mxu0 %v991_v28  ;;  %v919_v28 = vld [vmem:[%s3119_s19 + $0x158] sm:$0xff] }
 0x16c   : > { %v1451_v2 = vadd.f32 %v1450_v58, %v1386_v26  ;;  %1582 = vmatmul.f32.gmra.mxu2 %v3281_v15 }
 0x16d   : > { %1647 = vmatmul.f32.gmra.mxu3 %v3284_v16  ;;  %v1453_v47 = vpop.f32.mrf.mxu0  ;;  %v1518_v4 = vpop.f32.mrf.mxu1  ;;  %v1025_v16 = vld [vmem:[%s3119_s19 + $0x4a8] sm:$0xff]  ;;  %1957 = vmatpush.msrb.mxu0 %v989_v30 }
 0x16e   : > { %v3631_v27 = vadd.f32 %v1515_v31, %v1451_v2  ;;  %2020 = vmatpush.msrb.mxu1 %v1025_v16  ;;  %v921_v16 = vld [vmem:[%s3119_s19 + $0x168] sm:$0xff] }
 0x16f   : > { %v1323_v45 = vpop.f32.mrf.mxu2  ;;  %1829 = vmatpush.msrb.mxu2 %v921_v16  ;;  %1958 = vmatpush.msrb.mxu0 %v987_v14  ;;  %v915_v16 = vld [vmem:[%s3119_s19 + $0x138] sm:$0xff] }
 0x170   : > { %v1388_v8 = vpop.f32.mrf.mxu3  ;;  %v1324_v58 = vadd.f32 %v1323_v45, %v1259_v24  ;;  %1712 = vmatmul.f32.gmra.mxu0 %v3398_v33  ;;  %1777 = vmatmul.f32.gmra.mxu1 %v3225_v46  ;;  %v1262_v33 = vadd.f32 %v3511_v32, %v1197_v11  ;;  %v957_v46 = vld [vmem:[%s3119_s19 + $0x288] sm:$0xff]  ;;  %v1200_v32 = vadd.f32 %v3527_v59, %v3455_v17 }
 0x171   : > { %1892 = vmatpush.msrb.mxu3 %v957_v46  ;;  %1830 = vmatpush.msrb.mxu2 %v919_v28 }
 0x172   : > { %v1389_v31 = vadd.f32 %v1388_v8, %v1324_v58 }
 0x174   : > { %v1454_v18 = vadd.f32 %v1453_v47, %v1389_v31  ;;  %1585 = vmatmul.f32.gmra.mxu2 %v3309_v35 }
 0x175   : > { %1650 = vmatmul.f32.gmra.mxu3 %v3312_v36  ;;  %v1456_v48 = vpop.f32.mrf.mxu0  ;;  %v1521_v57 = vpop.f32.mrf.mxu1  ;;  %v1023_v36 = vld [vmem:[%s3119_s19 + $0x498] sm:$0xff] }
 0x176   : > { %v3644_v44 = vadd.f32 %v1518_v4, %v1454_v18  ;;  %2021 = vmatpush.msrb.mxu1 %v1023_v36  ;;  %v985_v36 = vld [vmem:[%s3119_s19 + $0x368] sm:$0xff] }
 0x177   : > { %v1326_v63 = vpop.f32.mrf.mxu2  ;;  %1959 = vmatpush.msrb.mxu0 %v985_v36 }
 0x178   : > { %v1391_v29 = vpop.f32.mrf.mxu3  ;;  %v1327_v49 = vadd.f32 %v1326_v63, %v1262_v33  ;;  %1715 = vmatmul.f32.gmra.mxu0 %v3408_v41  ;;  %1780 = vmatmul.f32.gmra.mxu1 %v3253_v62  ;;  %v1265_v41 = vadd.f32 %v3529_v38, %v1200_v32  ;;  %v955_v62 = vld [vmem:[%s3119_s19 + $0x278] sm:$0xff]  ;;  %v1203_v38 = vadd.f32 %v3544_v54, %v3455_v17 }
 0x179   : > { %1893 = vmatpush.msrb.mxu3 %v955_v62 }
 0x17a   : > { %v1392_v26 = vadd.f32 %v1391_v29, %v1327_v49  ;;  %v951_v49 = vld [vmem:[%s3119_s19 + $0x258] sm:$0xff] }
 0x17c   : > { %v1457_v2 = vadd.f32 %v1456_v48, %v1392_v26  ;;  %1588 = vmatmul.f32.gmra.mxu2 %v3334_v52  ;;  %v2567_v26 = vld [vmem:[%s3116_s11 + $0x90] sm:$0xff] }
 0x17d   : > { %1653 = vmatmul.f32.gmra.mxu3 %v3337_v53  ;;  %v1459_v47 = vpop.f32.mrf.mxu0  ;;  %v1524_v4 = vpop.f32.mrf.mxu1  ;;  %v1021_v53 = vld [vmem:[%s3119_s19 + $0x488] sm:$0xff] }
 0x17e   : > { %v3657_v24 = vadd.f32 %v1521_v57, %v1457_v2  ;;  %2022 = vmatpush.msrb.mxu1 %v1021_v53  ;;  %v1209_v2 = vadd.f32 %v3583_v22, %v3455_v17  ;;  %v1015_v53 = vld [vmem:[%s3119_s19 + $0x458] sm:$0xff] }
 0x17f   : > { %v1329_v39 = vpop.f32.mrf.mxu2 }
 0x180   : > { %v1394_v59 = vpop.f32.mrf.mxu3  ;;  %v1330_v45 = vadd.f32 %v1329_v39, %v1265_v41  ;;  %1718 = vmatmul.f32.gmra.mxu0 %v3419_v50  ;;  %1783 = vmatmul.f32.gmra.mxu1 %v3281_v15  ;;  %v1268_v50 = vadd.f32 %v3546_v20, %v1203_v38  ;;  %v953_v15 = vld [vmem:[%s3119_s19 + $0x268] sm:$0xff]  ;;  %v1206_v20 = vadd.f32 %v3562_v51, %v3455_v17  ;;  %v2568_v38 = vld [vmem:[%s3116_s11 + $0xc0] sm:$0xff] }
 0x181   : > { %1894 = vmatpush.msrb.mxu3 %v953_v15  ;;  %v1274_v62 = vadd.f32 %v3585_v42, %v1209_v2  ;;  %v949_v39 = vld [vmem:[%s3119_s19 + $0x248] sm:$0xff]  ;;  %v947_v15 = vld [vmem:[%s3119_s19 + $0x238] sm:$0xff] }
 0x182   : > { %v1395_v8 = vadd.f32 %v1394_v59, %v1330_v45  ;;  %v983_v59 = vld [vmem:[%s3119_s19 + $0x358] sm:$0xff] }
 0x183   : > { %1895 = vmatpush.msrb.mxu3 %v951_v49  ;;  %1960 = vmatpush.msrb.mxu0 %v983_v59  ;;  %v979_v49 = vld [vmem:[%s3119_s19 + $0x338] sm:$0xff]  ;;  %v3738_v59 = vld [vmem:[%s3116_s11 + $0xc0] sm:$0xff] }
 0x184   : > { %v1460_v58 = vadd.f32 %v1459_v47, %v1395_v8  ;;  %1591 = vmatmul.f32.gmra.mxu2 %v3354_v0  ;;  %v2584_v8 = vld [vmem:[%s3116_s11 + $0xc1] sm:$0xff] }
 0x185   : > { %1656 = vmatmul.f32.gmra.mxu3 %v3357_v1  ;;  %v1462_v11 = vpop.f32.mrf.mxu0  ;;  %v1527_v31 = vpop.f32.mrf.mxu1  ;;  %v1019_v1 = vld [vmem:[%s3119_s19 + $0x478] sm:$0xff] }
 0x186   : > { %v3670_v18 = vadd.f32 %v1524_v4, %v1460_v58  ;;  %2023 = vmatpush.msrb.mxu1 %v1019_v1  ;;  %v917_v4 = vld [vmem:[%s3119_s19 + $0x148] sm:$0xff]  ;;  %1896 = vmatpush.msrb.mxu3 %v949_v39 }
 0x187   : > { %v1332_v48 = vpop.f32.mrf.mxu2  ;;  %1831 = vmatpush.msrb.mxu2 %v917_v4  ;;  %v1013_v1 = vld [vmem:[%s3119_s19 + $0x448] sm:$0xff] }
 0x188   : > { %v1397_v54 = vpop.f32.mrf.mxu3  ;;  %v1333_v57 = vadd.f32 %v1332_v48, %v1268_v50  ;;  %1721 = vmatmul.f32.gmra.mxu0 %v3430_v61  ;;  %1786 = vmatmul.f32.gmra.mxu1 %v3309_v35  ;;  %v1271_v35 = vadd.f32 %v3564_v7, %v1206_v20  ;;  %v2583_v7 = vld [vmem:[%s3116_s11 + $0x91] sm:$0xff] }
 0x189   : > { %1832 = vmatpush.msrb.mxu2 %v915_v16  ;;  %1897 = vmatpush.msrb.mxu3 %v947_v15  ;;  %v2569_v20 = vld [vmem:[%s3116_s11 + $0xd0] sm:$0xff]  ;;  %v975_v16 = vld [vmem:[%s3119_s19 + $0x318] sm:$0xff] }
 0x18a   : > { %v1398_v33 = vadd.f32 %v1397_v54, %v1333_v57  ;;  %v2699_v57 = vld [vmem:[%s3116_s11 + $0xa0] sm:$0xff] }
 0x18c   : > { %v1463_v46 = vadd.f32 %v1462_v11, %v1398_v33  ;;  %1594 = vmatmul.f32.gmra.mxu2 %v3436_v3  ;;  %v2585_v33 = vld [vmem:[%s3116_s11 + $0xd1] sm:$0xff] }
 0x18d   : > { %1659 = vmatmul.f32.gmra.mxu3 %v3444_v9  ;;  %v1465_v63 = vpop.f32.mrf.mxu0  ;;  %v1530_v61 = vpop.f32.mrf.mxu1  ;;  %v1017_v9 = vld [vmem:[%s3119_s19 + $0x468] sm:$0xff] }
 0x18e   : > { %v3683_v29 = vadd.f32 %v1527_v31, %v1463_v46  ;;  %2024 = vmatpush.msrb.mxu1 %v1017_v9  ;;  %v1011_v9 = vld [vmem:[%s3119_s19 + $0x438] sm:$0xff] }
 0x18f   : > { %v1335_v51 = vpop.f32.mrf.mxu2 }
 0x190   : > { %v1400_v32 = vpop.f32.mrf.mxu3  ;;  %v1336_v3 = vadd.f32 %v1335_v51, %v1271_v35  ;;  %1724 = vmatmul.f32.gmra.mxu0 %v3447_v10  ;;  %1789 = vmatmul.f32.gmra.mxu1 %v3334_v52  ;;  %v2599_v52 = vld [vmem:[%s3116_s11 + $0x92] sm:$0xff]  ;;  %v945_v35 = vld [vmem:[%s3119_s19 + $0x228] sm:$0xff] }
 0x191   : > { %2025 = vmatpush.msrb.mxu1 %v1015_v53  ;;  %1898 = vmatpush.msrb.mxu3 %v945_v35  ;;  %v3766_v35 = vld [vmem:[%s3116_s11 + $0xe0] sm:$0xff] }
 0x192   : > { %v1401_v21 = vadd.f32 %v1400_v32, %v1336_v3  ;;  %v3724_v3 = vld [vmem:[%s3116_s11 + $0xb0] sm:$0xff] }
 0x193   : > { %2026 = vmatpush.msrb.mxu1 %v1013_v1 }
 0x194   : > { %v1466_v47 = vadd.f32 %v1465_v63, %v1401_v21  ;;  %1597 = vmatmul.f32.gmra.mxu2 %v2567_v26  ;;  %v913_v63 = vld [vmem:[%s3119_s19 + $0x128] sm:$0xff]  ;;  %v2570_v26 = vld [vmem:[%s3116_s11 + $0xe0] sm:$0xff] }
 0x195   : > { %1662 = vmatmul.f32.gmra.mxu3 %v2583_v7  ;;  %v1468_v41 = vpop.f32.mrf.mxu0  ;;  %v1533_v10 = vpop.f32.mrf.mxu1  ;;  %1833 = vmatpush.msrb.mxu2 %v913_v63  ;;  %v2586_v7 = vld [vmem:[%s3116_s11 + $0xe1] sm:$0xff] }
 0x196   : > { %v3697_v30 = vadd.f32 %v1530_v61, %v1466_v47  ;;  %2027 = vmatpush.msrb.mxu1 %v1011_v9  ;;  %v911_v47 = vld [vmem:[%s3119_s19 + $0x118] sm:$0xff] }
 0x197   : > { %v1338_v17 = vpop.f32.mrf.mxu2  ;;  %1834 = vmatpush.msrb.mxu2 %v911_v47 }
 0x198   : > { %v1403_v22 = vpop.f32.mrf.mxu3  ;;  %v1339_v45 = vadd.f32 %v1338_v17, %v1274_v62  ;;  %1727 = vmatmul.f32.gmra.mxu0 %v2599_v52  ;;  %1792 = vmatmul.f32.gmra.mxu1 %v3354_v0  ;;  %v981_v0 = vld [vmem:[%s3119_s19 + $0x348] sm:$0xff] }
 0x199   : > { %1961 = vmatpush.msrb.mxu0 %v981_v0  ;;  %v1009_v17 = vld [vmem:[%s3119_s19 + $0x428] sm:$0xff]  ;;  %v3752_v0 = vld [vmem:[%s3116_s11 + $0xd0] sm:$0xff] }
 0x19a   : > { %v1404_v42 = vadd.f32 %v1403_v22, %v1339_v45  ;;  %v2571_v22 = vld [vmem:[%s3116_s11 + $0xf0] sm:$0xff]  ;;  %2028 = vmatpush.msrb.mxu1 %v1009_v17 }
 0x19b   : > { %1962 = vmatpush.msrb.mxu0 %v979_v49  ;;  %v2587_v45 = vld [vmem:[%s3116_s11 + $0xf1] sm:$0xff]  ;;  %v1005_v49 = vld [vmem:[%s3119_s19 + $0x408] sm:$0xff] }
 0x19c   : > { %v1469_v58 = vadd.f32 %v1468_v41, %v1404_v42  ;;  %1600 = vmatmul.f32.gmra.mxu2 %v2568_v38  ;;  %v943_v41 = vld [vmem:[%s3119_s19 + $0x218] sm:$0xff] }
 0x19d   : > { %1665 = vmatmul.f32.gmra.mxu3 %v2584_v8  ;;  %v1471_v11 = vpop.f32.mrf.mxu0  ;;  %v1536_v31 = vpop.f32.mrf.mxu1  ;;  %v909_v8 = vld [vmem:[%s3119_s19 + $0x108] sm:$0xff]  ;;  %v4290_v17 = vld [vmem:[#allocation15_spill] sm:$0xff] }
 0x19e   : > { %v3706_v50 = vadd.f32 %v1533_v10, %v1469_v58  ;;  %v977_v10 = vld [vmem:[%s3119_s19 + $0x328] sm:$0xff]  ;;  %1899 = vmatpush.msrb.mxu3 %v943_v41  ;;  %1835 = vmatpush.msrb.mxu2 %v909_v8  ;;  %v3780_v41 = vld [vmem:[%s3116_s11 + $0xf0] sm:$0xff] }
 0x19f   : > { %v1341_v14 = vpop.f32.mrf.mxu2  ;;  %1963 = vmatpush.msrb.mxu0 %v977_v10  ;;  %v941_v58 = vld [vmem:[%s3119_s19 + $0x208] sm:$0xff]  ;;  %v1163_v10 = vld [vmem:[%s3119_s19 + $0x8f8] sm:$0xff] }
 0x1a0   : > { %v1406_v48 = vpop.f32.mrf.mxu3  ;;  %v1342_v54 = vadd.f32 %v1341_v14, %v3468_v37  ;;  %1730 = vmatmul.f32.gmra.mxu0 %v3479_v56  ;;  %1795 = vmatmul.f32.gmra.mxu1 %v2699_v57  ;;  %v1007_v14 = vld [vmem:[%s3119_s19 + $0x418] sm:$0xff] }
 0x1a1   : > { %1900 = vmatpush.msrb.mxu3 %v941_v58  ;;  %1964 = vmatpush.msrb.mxu0 %v975_v16  ;;  %v4292_v16 = vld [vmem:[#allocation16_spill] sm:$0xff] }
 0x1a2   : > { %v1407_v46 = vadd.f32 %v1406_v48, %v1342_v54  ;;  %v2572_v48 = vld [vmem:[%s3116_s11 + $0x100] sm:$0xff]  ;;  %2029 = vmatpush.msrb.mxu1 %v1007_v14  ;;  %v2591_v14 = vld [vmem:[%s3116_s11 + $0x131] sm:$0xff] }
 0x1a3   : > { %v2588_v54 = vld [vmem:[%s3116_s11 + $0x101] sm:$0xff] }
 0x1a4   : > { %v1472_v28 = vadd.f32 %v1471_v11, %v1407_v46  ;;  %1603 = vmatmul.f32.gmra.mxu2 %v2569_v20  ;;  %v1067_v20 = vld [vmem:[%s3119_s19 + $0x5f8] sm:$0xff]  ;;  %v973_v46 = vld [vmem:[%s3119_s19 + $0x308] sm:$0xff]  ;;  %2030 = vmatpush.msrb.mxu1 %v1005_v49  ;;  %v3808_v49 = vld [vmem:[%s3116_s11 + $0x110] sm:$0xff] }
 0x1a5   : > { %1668 = vmatmul.f32.gmra.mxu3 %v2585_v33  ;;  %v1474_v61 = vpop.f32.mrf.mxu0  ;;  %v1539_v37 = vpop.f32.mrf.mxu1  ;;  %2080 = vmatpush.msra.mxu2 %v1067_v20  ;;  %v2607_v20 = vld [vmem:[%s3116_s11 + $0x132] sm:$0xff] }
 0x1a6   : > { %v3717_v56 = vadd.f32 %v1536_v31, %v1472_v28  ;;  %v1099_v28 = vld [vmem:[%s3119_s19 + $0x6f8] sm:$0xff]  ;;  %1965 = vmatpush.msrb.mxu0 %v973_v46  ;;  %2275 = vmatpush.msra.mxu1 %v1163_v10  ;;  %v1093_v46 = vld [vmem:[%s3119_s19 + $0x6c8] sm:$0xff] }
 0x1a7   : > { %v1344_v36 = vpop.f32.mrf.mxu2  ;;  %2145 = vmatpush.msra.mxu3 %v1099_v28  ;;  %v1127_v28 = vld [vmem:[%s3119_s19 + $0x7d8] sm:$0xff] }
 0x1a8   : > { %v1409_v51 = vpop.f32.mrf.mxu3  ;;  %v1345_v32 = vadd.f32 %v1344_v36, %v3485_v60  ;;  %1733 = vmatmul.f32.gmra.mxu0 %v3497_v13  ;;  %1798 = vmatmul.f32.gmra.mxu1 %v3724_v3  ;;  %v2573_v36 = vld [vmem:[%s3116_s11 + $0x110] sm:$0xff] }
 0x1aa   : > { %v1410_v2 = vadd.f32 %v1409_v51, %v1345_v32  ;;  %v2589_v51 = vld [vmem:[%s3116_s11 + $0x111] sm:$0xff] }
 0x1ac   : > { %v1475_v21 = vadd.f32 %v1474_v61, %v1410_v2  ;;  %1606 = vmatmul.f32.gmra.mxu2 %v2570_v26  ;;  %v1097_v2 = vld [vmem:[%s3119_s19 + $0x6e8] sm:$0xff] }
 0x1ad   : > { %1671 = vmatmul.f32.gmra.mxu3 %v2586_v7  ;;  %v1477_v60 = vpop.f32.mrf.mxu0  ;;  %v1542_v13 = vpop.f32.mrf.mxu1 }
 0x1ae   : > { %v3731_v4 = vadd.f32 %v1539_v37, %v1475_v21  ;;  %v1131_v21 = vld [vmem:[%s3119_s19 + $0x7f8] sm:$0xff]  ;;  %2146 = vmatpush.msra.mxu3 %v1097_v2 }
 0x1af   : > { %v1347_v52 = vpop.f32.mrf.mxu2  ;;  %2210 = vmatpush.msra.mxu0 %v1131_v21  ;;  %v1059_v2 = vld [vmem:[%s3119_s19 + $0x5b8] sm:$0xff] }
 0x1b0   : > { %v1412_v62 = vpop.f32.mrf.mxu3  ;;  %v1348_v39 = vadd.f32 %v1347_v52, %v3503_v19  ;;  %1736 = vmatmul.f32.gmra.mxu0 %v3515_v40  ;;  %1801 = vmatmul.f32.gmra.mxu1 %v3738_v59  ;;  %v1091_v21 = vld [vmem:[%s3119_s19 + $0x6b8] sm:$0xff] }
 0x1b2   : > { %v1413_v53 = vadd.f32 %v1412_v62, %v1348_v39  ;;  %v4289_v39 = vld [vmem:[#allocation13_spill] sm:$0xff] }
 0x1b4   : > { %v1478_v38 = vadd.f32 %v1477_v60, %v1413_v53  ;;  %1609 = vmatmul.f32.gmra.mxu2 %v2571_v22  ;;  %v1095_v53 = vld [vmem:[%s3119_s19 + $0x6d8] sm:$0xff] }
 0x1b5   : > { %1674 = vmatmul.f32.gmra.mxu3 %v2587_v45  ;;  %v1480_v19 = vpop.f32.mrf.mxu0  ;;  %v1545_v40 = vpop.f32.mrf.mxu1  ;;  %v1063_v45 = vld [vmem:[%s3119_s19 + $0x5d8] sm:$0xff] }
 0x1b6   : > { %v3745_v42 = vadd.f32 %v1542_v13, %v1478_v38  ;;  %v1129_v38 = vld [vmem:[%s3119_s19 + $0x7e8] sm:$0xff]  ;;  %2147 = vmatpush.msra.mxu3 %v1095_v53 }
 0x1b7   : > { %v1350_v11 = vpop.f32.mrf.mxu2  ;;  %2211 = vmatpush.msra.mxu0 %v1129_v38  ;;  %v1057_v53 = vld [vmem:[%s3119_s19 + $0x5a8] sm:$0xff] }
 0x1b8   : > { %v1415_v31 = vpop.f32.mrf.mxu3  ;;  %v1351_v15 = vadd.f32 %v1350_v11, %v3521_v43  ;;  %1739 = vmatmul.f32.gmra.mxu0 %v3533_v5  ;;  %1804 = vmatmul.f32.gmra.mxu1 %v3752_v0  ;;  %v3794_v11 = vld [vmem:[%s3116_s11 + $0x100] sm:$0xff]  ;;  %v1089_v38 = vld [vmem:[%s3119_s19 + $0x6a8] sm:$0xff] }
 0x1b9   : > { %2148 = vmatpush.msra.mxu3 %v1093_v46  ;;  %2212 = vmatpush.msra.mxu0 %v1127_v28 }
 0x1ba   : > { %v1416_v57 = vadd.f32 %v1415_v31, %v1351_v15  ;;  %v1161_v31 = vld [vmem:[%s3119_s19 + $0x8e8] sm:$0xff]  ;;  %v2575_v15 = vld [vmem:[%s3116_s11 + $0x130] sm:$0xff] }
 0x1bb   : > { %2276 = vmatpush.msra.mxu1 %v1161_v31  ;;  %2149 = vmatpush.msra.mxu3 %v1091_v21  ;;  %v3844_v31 = vld [vmem:[%s3116_s11 + $0x21] sm:$0xff]  ;;  %v1119_v21 = vld [vmem:[%s3119_s19 + $0x798] sm:$0xff] }
 0x1bc   : > { %v1481_v1 = vadd.f32 %v1480_v19, %v1416_v57  ;;  %1612 = vmatmul.f32.gmra.mxu2 %v2572_v48 }
 0x1bd   : > { %1677 = vmatmul.f32.gmra.mxu3 %v2588_v54  ;;  %v1483_v43 = vpop.f32.mrf.mxu0  ;;  %v1548_v5 = vpop.f32.mrf.mxu1 }
 0x1be   : > { %v3759_v33 = vadd.f32 %v1545_v40, %v1481_v1  ;;  %v4291_v40 = vld [vmem:[#allocation14_spill] sm:$0xff]  ;;  %2150 = vmatpush.msra.mxu3 %v1089_v38  ;;  %v1083_v38 = vld [vmem:[%s3119_s19 + $0x678] sm:$0xff] }
 0x1bf   : > { %v1353_v63 = vpop.f32.mrf.mxu2 }
 0x1c0   : > { %v1418_v61 = vpop.f32.mrf.mxu3  ;;  %v1354_v37 = vadd.f32 %v1353_v63, %v3539_v12  ;;  %1742 = vmatmul.f32.gmra.mxu0 %v3551_v34  ;;  %1807 = vmatmul.f32.gmra.mxu1 %v3766_v35  ;;  %v1065_v34 = vld [vmem:[%s3119_s19 + $0x5e8] sm:$0xff] }
 0x1c1   : > { %2081 = vmatpush.msra.mxu2 %v1065_v34 }
 0x1c2   : > { %v1419_v32 = vadd.f32 %v1418_v61, %v1354_v37 }
 0x1c3   : > { %2082 = vmatpush.msra.mxu2 %v1063_v45 }
 0x1c4   : > { %v1484_v9 = vadd.f32 %v1483_v43, %v1419_v32  ;;  %1615 = vmatmul.f32.gmra.mxu2 %v2573_v36  ;;  %v1159_v36 = vld [vmem:[%s3119_s19 + $0x8d8] sm:$0xff] }
 0x1c5   : > { %1680 = vmatmul.f32.gmra.mxu3 %v2589_v51  ;;  %v1486_v26 = vpop.f32.mrf.mxu0  ;;  %v1551_v12 = vpop.f32.mrf.mxu1  ;;  %2277 = vmatpush.msra.mxu1 %v1159_v36  ;;  %v1153_v36 = vld [vmem:[%s3119_s19 + $0x8a8] sm:$0xff] }
 0x1c6   : > { %v3772_v7 = vadd.f32 %v1548_v5, %v1484_v9  ;;  %v1061_v5 = vld [vmem:[%s3119_s19 + $0x5c8] sm:$0xff] }
 0x1c7   : > { %v1356_v47 = vpop.f32.mrf.mxu2  ;;  %2083 = vmatpush.msra.mxu2 %v1061_v5  ;;  %v2707_v9 = vld [vmem:[%s3116_s11 + $0x1] sm:$0xff] }
 0x1c8   : > { %v1421_v60 = vpop.f32.mrf.mxu3  ;;  %v1357_v13 = vadd.f32 %v1356_v47, %v3557_v6  ;;  %1745 = vmatmul.f32.gmra.mxu0 %v3569_v25  ;;  %1810 = vmatmul.f32.gmra.mxu1 %v3780_v41  ;;  %v1125_v47 = vld [vmem:[%s3119_s19 + $0x7c8] sm:$0xff] }
 0x1c9   : > { %2084 = vmatpush.msra.mxu2 %v1059_v2  ;;  %2213 = vmatpush.msra.mxu0 %v1125_v47  ;;  %v1121_v5 = vld [vmem:[%s3119_s19 + $0x7a8] sm:$0xff] }
 0x1ca   : > { %v1422_v52 = vadd.f32 %v1421_v60, %v1357_v13  ;;  %v1085_v2 = vld [vmem:[%s3119_s19 + $0x688] sm:$0xff] }
 0x1cb   : > { %2085 = vmatpush.msra.mxu2 %v1057_v53  ;;  %v1051_v53 = vld [vmem:[%s3119_s19 + $0x578] sm:$0xff] }
 0x1cc   : > { %v1487_v62 = vadd.f32 %v1486_v26, %v1422_v52  ;;  %1618 = vmatmul.f32.gmra.mxu2 %v4289_v39  ;;  %v2708_v26 = vld [vmem:[%s3116_s11 + $0x2] sm:$0xff]  ;;  %v2709_v52 = vld [vmem:[%s3116_s11 + $0x10] sm:$0xff] }
 0x1cd   : > { %1683 = vmatmul.f32.gmra.mxu3 %v4290_v17  ;;  %v1489_v6 = vpop.f32.mrf.mxu0  ;;  %v1554_v22 = vpop.f32.mrf.mxu1  ;;  %v1157_v39 = vld [vmem:[%s3119_s19 + $0x8c8] sm:$0xff] }
 0x1ce   : > { %v3786_v25 = vadd.f32 %v1551_v12, %v1487_v62  ;;  %v2710_v62 = vld [vmem:[%s3116_s11 + $0x11] sm:$0xff]  ;;  %2278 = vmatpush.msra.mxu1 %v1157_v39 }
 0x1cf   : > { %v1359_v8 = vpop.f32.mrf.mxu2 }
 0x1d0   : > { %v1424_v19 = vpop.f32.mrf.mxu3  ;;  %v1360_v58 = vadd.f32 %v1359_v8, %v4291_v40  ;;  %1748 = vmatmul.f32.gmra.mxu0 %v4292_v16  ;;  %1813 = vmatmul.f32.gmra.mxu1 %v3794_v11  ;;  %v1123_v8 = vld [vmem:[%s3119_s19 + $0x7b8] sm:$0xff]  ;;  %v3840_v16 = vld [vmem:[%s3116_s11 + $0x20] sm:$0xff] }
 0x1d1   : > { %2214 = vmatpush.msra.mxu0 %v1123_v8  ;;  %v1117_v8 = vld [vmem:[%s3119_s19 + $0x788] sm:$0xff] }
 0x1d2   : > { %v1425_v48 = vadd.f32 %v1424_v19, %v1360_v58 }
 0x1d3   : > { %2215 = vmatpush.msra.mxu0 %v1121_v5 }
 0x1d4   : > { %v1490_v54 = vadd.f32 %v1489_v6, %v1425_v48  ;;  %1621 = vmatmul.f32.gmra.mxu2 %v2575_v15  ;;  %v1155_v15 = vld [vmem:[%s3119_s19 + $0x8b8] sm:$0xff] }
 0x1d5   : > { %1686 = vmatmul.f32.gmra.mxu3 %v2591_v14  ;;  %v1492_v57 = vpop.f32.mrf.mxu0  ;;  %v1557_v1 = vpop.f32.mrf.mxu1  ;;  %2279 = vmatpush.msra.mxu1 %v1155_v15  ;;  %v3903_v15 = vld [vmem:[%s3116_s11 + $0x50] sm:$0xff] }
 0x1d6   : > { %v3801_v43 = vadd.f32 %v1554_v22, %v1490_v54  ;;  %v3827_v22 = vld [vmem:[%s3116_s11 + $0x12] sm:$0xff]  ;;  %2216 = vmatpush.msra.mxu0 %v1119_v21 }
 0x1d7   : > { %v1362_v63 = vpop.f32.mrf.mxu2  ;;  %2280 = vmatpush.msra.mxu1 %v1153_v36 }
 0x1d8   : > { %v1427_v61 = vpop.f32.mrf.mxu3  ;;  %v1363_v37 = vadd.f32 %v1362_v63, %v3601_v55  ;;  %1751 = vmatmul.f32.gmra.mxu0 %v2607_v20  ;;  %1816 = vmatmul.f32.gmra.mxu1 %v3808_v49  ;;  %v1087_v20 = vld [vmem:[%s3119_s19 + $0x698] sm:$0xff] }
 0x1d9   : > { %2151 = vmatpush.msra.mxu3 %v1087_v20  ;;  %2217 = vmatpush.msra.mxu0 %v1117_v8  ;;  %v3945_v8 = vld [vmem:[%s3116_s11 + $0x70] sm:$0xff] }
 0x1da   : > { %v1428_v51 = vadd.f32 %v1427_v61, %v1363_v37  ;;  %v3861_v61 = vld [vmem:[%s3116_s11 + $0x30] sm:$0xff] }
 0x1db   : > { %v3865_v37 = vld [vmem:[%s3116_s11 + $0x31] sm:$0xff]  ;;  %2152 = vmatpush.msra.mxu3 %v1085_v2 }
 0x1dc   : > { %v1493_v32 = vadd.f32 %v1492_v57, %v1428_v51  ;;  %1836 = vmatmul.f32.vlgmr.msrb.gmra.mxu2 %v2707_v9  ;;  %v1147_v2 = vld [vmem:[%s3119_s19 + $0x878] sm:$0xff] }
 0x1dd   : > { %1901 = vmatmul.f32.vlgmr.msrb.gmra.mxu3 %v2708_v26  ;;  %v1707_v55 = vpop.f32.mrf.mxu0  ;;  %v3814_v12 = vpop.f32.mrf.mxu1 }
 0x1de   : > { %v3816_v34 = vadd.f32 %v1557_v1, %v1493_v32  ;;  %v1055_v1 = vld [vmem:[%s3119_s19 + $0x598] sm:$0xff]  ;;  %2153 = vmatpush.msra.mxu3 %v1083_v38 }
 0x1df   : > { %v1577_v60 = vpop.f32.mrf.mxu2  ;;  %2086 = vmatpush.msra.mxu2 %v1055_v1 }
 0x1e0   : > { %v1642_v13 = vpop.f32.mrf.mxu3  ;;  %v1578_v10 = vadd.f32 %v1577_v60, %v3618_v23  ;;  %1966 = vmatmul.f32.vlgmr.msrb.gmra.mxu0 %v2709_v52  ;;  %2031 = vmatmul.f32.vlgmr.msrb.gmra.mxu1 %v2710_v62  ;;  %v3886_v52 = vld [vmem:[%s3116_s11 + $0x41] sm:$0xff] }
 0x1e2   : > { %v1643_v17 = vadd.f32 %v1642_v13, %v1578_v10  ;;  %v3882_v10 = vld [vmem:[%s3116_s11 + $0x40] sm:$0xff] }
 0x1e4   : > { %v1708_v6 = vadd.f32 %v1707_v55, %v1643_v17  ;;  %1839 = vmatmul.f32.gmra.mxu2 %v2710_v62  ;;  %v1053_v55 = vld [vmem:[%s3119_s19 + $0x588] sm:$0xff]  ;;  %v1151_v62 = vld [vmem:[%s3119_s19 + $0x898] sm:$0xff] }
 0x1e5   : > { %1904 = vmatmul.f32.gmra.mxu3 %v3827_v22  ;;  %v1710_v23 = vpop.f32.mrf.mxu0  ;;  %v3830_v45 = vpop.f32.mrf.mxu1  ;;  %2087 = vmatpush.msra.mxu2 %v1053_v55  ;;  %v3928_v55 = vld [vmem:[%s3116_s11 + $0x61] sm:$0xff] }
 0x1e6   : > { %2340 = vst [vmem:[%s3832_s28] sm:$0xff] %v1708_v6  ;;  %2281 = vmatpush.msra.mxu1 %v1151_v62  ;;  %v1047_v62 = vld [vmem:[%s3119_s19 + $0x558] sm:$0xff] }
 0x1e7   : > { %v1580_v19 = vpop.f32.mrf.mxu2  ;;  %2088 = vmatpush.msra.mxu2 %v1051_v53 }
 0x1e8   : > { %v1645_v40 = vpop.f32.mrf.mxu3  ;;  %v1581_v58 = vadd.f32 %v1580_v19, %v3631_v27  ;;  %1969 = vmatmul.f32.gmra.mxu0 %v3840_v16  ;;  %2034 = vmatmul.f32.gmra.mxu1 %v3844_v31  ;;  %v3850_v27 = vld [vmem:[%s3116_s11 + $0x22] sm:$0xff] }
 0x1ea   : > { %v1646_v14 = vadd.f32 %v1645_v40, %v1581_v58 }
 0x1ec   : > { %v1711_v48 = vadd.f32 %v1710_v23, %v1646_v14  ;;  %1842 = vmatmul.f32.gmra.mxu2 %v3844_v31  ;;  %v3907_v14 = vld [vmem:[%s3116_s11 + $0x51] sm:$0xff] }
 0x1ed   : > { %1907 = vmatmul.f32.gmra.mxu3 %v3850_v27  ;;  %v1713_v54 = vpop.f32.mrf.mxu0  ;;  %v3853_v57 = vpop.f32.mrf.mxu1 }
 0x1ee   : > { %2342 = vst [vmem:[%s3832_s28 + $0x10] sm:$0xff] %v1711_v48  ;;  %v1149_v48 = vld [vmem:[%s3119_s19 + $0x888] sm:$0xff] }
 0x1ef   : > { %v1583_v46 = vpop.f32.mrf.mxu2  ;;  %2282 = vmatpush.msra.mxu1 %v1149_v48 }
 0x1f0   : > { %v1648_v28 = vpop.f32.mrf.mxu3  ;;  %v1584_v63 = vadd.f32 %v1583_v46, %v3644_v44  ;;  %1972 = vmatmul.f32.gmra.mxu0 %v3861_v61  ;;  %2037 = vmatmul.f32.gmra.mxu1 %v3865_v37  ;;  %v3871_v44 = vld [vmem:[%s3116_s11 + $0x32] sm:$0xff]  ;;  %v1049_v46 = vld [vmem:[%s3119_s19 + $0x568] sm:$0xff] }
 0x1f1   : > { %2089 = vmatpush.msra.mxu2 %v1049_v46  ;;  %2283 = vmatpush.msra.mxu1 %v1147_v2  ;;  %v1077_v46 = vld [vmem:[%s3119_s19 + $0x648] sm:$0xff] }
 0x1f2   : > { %v1649_v51 = vadd.f32 %v1648_v28, %v1584_v63  ;;  %v1081_v28 = vld [vmem:[%s3119_s19 + $0x668] sm:$0xff]  ;;  %v1115_v63 = vld [vmem:[%s3119_s19 + $0x778] sm:$0xff] }
 0x1f3   : > { %2154 = vmatpush.msra.mxu3 %v1081_v28  ;;  %2218 = vmatpush.msra.mxu0 %v1115_v63  ;;  %v1111_v28 = vld [vmem:[%s3119_s19 + $0x758] sm:$0xff]  ;;  %v3970_v2 = vld [vmem:[%s3116_s11 + $0x81] sm:$0xff] }
 0x1f4   : > { %v1714_v32 = vadd.f32 %v1713_v54, %v1649_v51  ;;  %1845 = vmatmul.f32.gmra.mxu2 %v3865_v37 }
 0x1f5   : > { %1910 = vmatmul.f32.gmra.mxu3 %v3871_v44  ;;  %v1716_v9 = vpop.f32.mrf.mxu0  ;;  %v3874_v26 = vpop.f32.mrf.mxu1  ;;  %2090 = vmatpush.msra.mxu2 %v1047_v62  ;;  %v2732_v62 = vld [vmem:[%s3116_s11 + $0xa1] sm:$0xff] }
 0x1f6   : > { %2344 = vst [vmem:[%s3832_s28 + $0x20] sm:$0xff] %v1714_v32 }
 0x1f7   : > { %v1586_v47 = vpop.f32.mrf.mxu2 }
 0x1f8   : > { %v1651_v60 = vpop.f32.mrf.mxu3  ;;  %v1587_v13 = vadd.f32 %v1586_v47, %v3657_v24  ;;  %1975 = vmatmul.f32.gmra.mxu0 %v3882_v10  ;;  %2040 = vmatmul.f32.gmra.mxu1 %v3886_v52  ;;  %v3892_v24 = vld [vmem:[%s3116_s11 + $0x42] sm:$0xff] }
 0x1fa   : > { %v1652_v39 = vadd.f32 %v1651_v60, %v1587_v13 }
 0x1fc   : > { %v1717_v17 = vadd.f32 %v1716_v9, %v1652_v39  ;;  %1848 = vmatmul.f32.gmra.mxu2 %v3886_v52  ;;  %v3924_v9 = vld [vmem:[%s3116_s11 + $0x60] sm:$0xff]  ;;  %v1079_v39 = vld [vmem:[%s3119_s19 + $0x658] sm:$0xff] }
 0x1fd   : > { %1913 = vmatmul.f32.gmra.mxu3 %v3892_v24  ;;  %v1719_v6 = vpop.f32.mrf.mxu0  ;;  %v3895_v23 = vpop.f32.mrf.mxu1 }
 0x1fe   : > { %2346 = vst [vmem:[%s3832_s28 + $0x30] sm:$0xff] %v1717_v17  ;;  %v1113_v17 = vld [vmem:[%s3119_s19 + $0x768] sm:$0xff]  ;;  %2155 = vmatpush.msra.mxu3 %v1079_v39 }
 0x1ff   : > { %v1589_v19 = vpop.f32.mrf.mxu2  ;;  %2219 = vmatpush.msra.mxu0 %v1113_v17 }
 0x200   : > { %v1654_v40 = vpop.f32.mrf.mxu3  ;;  %v1590_v58 = vadd.f32 %v1589_v19, %v3670_v18  ;;  %1978 = vmatmul.f32.gmra.mxu0 %v3903_v15  ;;  %2043 = vmatmul.f32.gmra.mxu1 %v3907_v14  ;;  %v3913_v18 = vld [vmem:[%s3116_s11 + $0x52] sm:$0xff] }
 0x201   : > { %v3949_v19 = vld [vmem:[%s3116_s11 + $0x71] sm:$0xff]  ;;  %2156 = vmatpush.msra.mxu3 %v1077_v46  ;;  %2220 = vmatpush.msra.mxu0 %v1111_v28 }
 0x202   : > { %v1655_v54 = vadd.f32 %v1654_v40, %v1590_v58  ;;  %v1145_v40 = vld [vmem:[%s3119_s19 + $0x868] sm:$0xff] }
 0x203   : > { %2284 = vmatpush.msra.mxu1 %v1145_v40 }
 0x204   : > { %v1720_v1 = vadd.f32 %v1719_v6, %v1655_v54  ;;  %1851 = vmatmul.f32.gmra.mxu2 %v3907_v14 }
 0x205   : > { %1916 = vmatmul.f32.gmra.mxu3 %v3913_v18  ;;  %v1722_v20 = vpop.f32.mrf.mxu0  ;;  %v3916_v5 = vpop.f32.mrf.mxu1 }
 0x206   : > { %2348 = vst [vmem:[%s3832_s28 + $0x40] sm:$0xff] %v1720_v1 }
 0x207   : > { %v1592_v36 = vpop.f32.mrf.mxu2 }
 0x208   : > { %v1657_v51 = vpop.f32.mrf.mxu3  ;;  %v1593_v32 = vadd.f32 %v1592_v36, %v3683_v29  ;;  %1981 = vmatmul.f32.gmra.mxu0 %v3924_v9  ;;  %2046 = vmatmul.f32.gmra.mxu1 %v3928_v55  ;;  %v3934_v29 = vld [vmem:[%s3116_s11 + $0x62] sm:$0xff] }
 0x20a   : > { %v1658_v21 = vadd.f32 %v1657_v51, %v1593_v32  ;;  %v3966_v32 = vld [vmem:[%s3116_s11 + $0x80] sm:$0xff] }
 0x20c   : > { %v1723_v47 = vadd.f32 %v1722_v20, %v1658_v21  ;;  %1854 = vmatmul.f32.gmra.mxu2 %v3928_v55  ;;  %v1045_v20 = vld [vmem:[%s3119_s19 + $0x548] sm:$0xff]  ;;  %v1143_v21 = vld [vmem:[%s3119_s19 + $0x858] sm:$0xff] }
 0x20d   : > { %1919 = vmatmul.f32.gmra.mxu3 %v3934_v29  ;;  %v1725_v60 = vpop.f32.mrf.mxu0  ;;  %v3937_v13 = vpop.f32.mrf.mxu1  ;;  %2091 = vmatpush.msra.mxu2 %v1045_v20  ;;  %v1141_v20 = vld [vmem:[%s3119_s19 + $0x848] sm:$0xff] }
 0x20e   : > { %2350 = vst [vmem:[%s3832_s28 + $0x50] sm:$0xff] %v1723_v47  ;;  %2285 = vmatpush.msra.mxu1 %v1143_v21  ;;  %v1107_v21 = vld [vmem:[%s3119_s19 + $0x738] sm:$0xff] }
 0x20f   : > { %v1595_v6 = vpop.f32.mrf.mxu2 }
 0x210   : > { %v1660_v53 = vpop.f32.mrf.mxu3  ;;  %v1596_v38 = vadd.f32 %v1595_v6, %v3697_v30  ;;  %1984 = vmatmul.f32.gmra.mxu0 %v3945_v8  ;;  %2049 = vmatmul.f32.gmra.mxu1 %v3949_v19  ;;  %v3955_v30 = vld [vmem:[%s3116_s11 + $0x72] sm:$0xff] }
 0x211   : > { %v1043_v6 = vld [vmem:[%s3119_s19 + $0x538] sm:$0xff]  ;;  %2286 = vmatpush.msra.mxu1 %v1141_v20 }
 0x212   : > { %v1661_v58 = vadd.f32 %v1660_v53, %v1596_v38  ;;  %v1075_v53 = vld [vmem:[%s3119_s19 + $0x638] sm:$0xff]  ;;  %v1109_v38 = vld [vmem:[%s3119_s19 + $0x748] sm:$0xff]  ;;  %2092 = vmatpush.msra.mxu2 %v1043_v6 }
 0x213   : > { %2157 = vmatpush.msra.mxu3 %v1075_v53  ;;  %2221 = vmatpush.msra.mxu0 %v1109_v38  ;;  %v4001_v38 = vld [vmem:[%s3116_s11 + $0xc2] sm:$0xff] }
 0x214   : > { %v1726_v48 = vadd.f32 %v1725_v60, %v1661_v58  ;;  %1857 = vmatmul.f32.gmra.mxu2 %v3949_v19 }
 0x215   : > { %1922 = vmatmul.f32.gmra.mxu3 %v3955_v30  ;;  %v1728_v54 = vpop.f32.mrf.mxu0  ;;  %v3958_v1 = vpop.f32.mrf.mxu1  ;;  %2222 = vmatpush.msra.mxu0 %v1107_v21  ;;  %v4015_v21 = vld [vmem:[%s3116_s11 + $0xd2] sm:$0xff] }
 0x216   : > { %2352 = vst [vmem:[%s3832_s28 + $0x60] sm:$0xff] %v1726_v48 }
 0x217   : > { %v1598_v63 = vpop.f32.mrf.mxu2 }
 0x218   : > { %v1663_v36 = vpop.f32.mrf.mxu3  ;;  %v1599_v51 = vadd.f32 %v1598_v63, %v3706_v50  ;;  %1987 = vmatmul.f32.gmra.mxu0 %v3966_v32  ;;  %2052 = vmatmul.f32.gmra.mxu1 %v3970_v2  ;;  %v2733_v50 = vld [vmem:[%s3116_s11 + $0xa2] sm:$0xff]  ;;  %v3987_v63 = vld [vmem:[%s3116_s11 + $0xb2] sm:$0xff] }
 0x21a   : > { %v1664_v47 = vadd.f32 %v1663_v36, %v1599_v51  ;;  %v1073_v51 = vld [vmem:[%s3119_s19 + $0x628] sm:$0xff] }
 0x21b   : > { %2158 = vmatpush.msra.mxu3 %v1073_v51 }
 0x21c   : > { %v1729_v60 = vadd.f32 %v1728_v54, %v1664_v47  ;;  %1860 = vmatmul.f32.gmra.mxu2 %v2732_v62  ;;  %v2734_v54 = vld [vmem:[%s3116_s11 + $0xb1] sm:$0xff] }
 0x21d   : > { %1925 = vmatmul.f32.gmra.mxu3 %v2733_v50  ;;  %v1731_v39 = vpop.f32.mrf.mxu0  ;;  %v3976_v17 = vpop.f32.mrf.mxu1  ;;  %v2736_v50 = vld [vmem:[%s3116_s11 + $0xc1] sm:$0xff] }
 0x21e   : > { %2354 = vst [vmem:[%s3832_s28 + $0x70] sm:$0xff] %v1729_v60 }
 0x21f   : > { %v1601_v40 = vpop.f32.mrf.mxu2 }
 0x220   : > { %v1666_v58 = vpop.f32.mrf.mxu3  ;;  %v1602_v48 = vadd.f32 %v1601_v40, %v3717_v56  ;;  %1990 = vmatmul.f32.gmra.mxu0 %v3724_v3  ;;  %2055 = vmatmul.f32.gmra.mxu1 %v2734_v54  ;;  %v1041_v3 = vld [vmem:[%s3119_s19 + $0x528] sm:$0xff] }
 0x221   : > { %2093 = vmatpush.msra.mxu2 %v1041_v3 }
 0x222   : > { %v1667_v46 = vadd.f32 %v1666_v58, %v1602_v48  ;;  %v1071_v58 = vld [vmem:[%s3119_s19 + $0x618] sm:$0xff]  ;;  %v1105_v48 = vld [vmem:[%s3119_s19 + $0x728] sm:$0xff] }
 0x223   : > { %2159 = vmatpush.msra.mxu3 %v1071_v58  ;;  %2223 = vmatpush.msra.mxu0 %v1105_v48  ;;  %v4029_v48 = vld [vmem:[%s3116_s11 + $0xe2] sm:$0xff] }
 0x224   : > { %v1732_v28 = vadd.f32 %v1731_v39, %v1667_v46  ;;  %1863 = vmatmul.f32.gmra.mxu2 %v2734_v54  ;;  %v1139_v39 = vld [vmem:[%s3119_s19 + $0x838] sm:$0xff] }
 0x225   : > { %1928 = vmatmul.f32.gmra.mxu3 %v3987_v63  ;;  %v1734_v36 = vpop.f32.mrf.mxu0  ;;  %v3990_v56 = vpop.f32.mrf.mxu1  ;;  %2287 = vmatpush.msra.mxu1 %v1139_v39 }
 0x226   : > { %2356 = vst [vmem:[%s3832_s28 + $0x80] sm:$0xff] %v1732_v28  ;;  %v2738_v28 = vld [vmem:[%s3116_s11 + $0xd1] sm:$0xff] }
 0x227   : > { %v1604_v47 = vpop.f32.mrf.mxu2 }
 0x228   : > { %v1669_v60 = vpop.f32.mrf.mxu3  ;;  %v1605_v62 = vadd.f32 %v1604_v47, %v3731_v4  ;;  %1993 = vmatmul.f32.gmra.mxu0 %v3738_v59  ;;  %2058 = vmatmul.f32.gmra.mxu1 %v2736_v50  ;;  %v1039_v59 = vld [vmem:[%s3119_s19 + $0x518] sm:$0xff] }
 0x229   : > { %2094 = vmatpush.msra.mxu2 %v1039_v59 }
 0x22a   : > { %v1670_v6 = vadd.f32 %v1669_v60, %v1605_v62  ;;  %v1069_v60 = vld [vmem:[%s3119_s19 + $0x608] sm:$0xff]  ;;  %v1103_v62 = vld [vmem:[%s3119_s19 + $0x718] sm:$0xff] }
 0x22b   : > { %2160 = vmatpush.msra.mxu3 %v1069_v60  ;;  %2224 = vmatpush.msra.mxu0 %v1103_v62 }
 0x22c   : > { %v1735_v53 = vadd.f32 %v1734_v36, %v1670_v6  ;;  %1866 = vmatmul.f32.gmra.mxu2 %v2736_v50  ;;  %v1137_v36 = vld [vmem:[%s3119_s19 + $0x828] sm:$0xff] }
 0x22d   : > { %1931 = vmatmul.f32.gmra.mxu3 %v4001_v38  ;;  %v1737_v40 = vpop.f32.mrf.mxu0  ;;  %v4004_v4 = vpop.f32.mrf.mxu1  ;;  %2288 = vmatpush.msra.mxu1 %v1137_v36  ;;  %v2742_v36 = vld [vmem:[%s3116_s11 + $0xf1] sm:$0xff] }
 0x22e   : > { %2358 = vst [vmem:[%s3832_s28 + $0x90] sm:$0xff] %v1735_v53  ;;  %v2740_v53 = vld [vmem:[%s3116_s11 + $0xe1] sm:$0xff] }
 0x22f   : > { %v1607_v54 = vpop.f32.mrf.mxu2 }
 0x230   : > { %v1672_v20 = vpop.f32.mrf.mxu3  ;;  %v1608_v46 = vadd.f32 %v1607_v54, %v3745_v42  ;;  %1996 = vmatmul.f32.gmra.mxu0 %v3752_v0  ;;  %2061 = vmatmul.f32.gmra.mxu1 %v2738_v28  ;;  %v1037_v0 = vld [vmem:[%s3119_s19 + $0x508] sm:$0xff] }
 0x231   : > { %2095 = vmatpush.msra.mxu2 %v1037_v0  ;;  %v4041_v0 = vld [vmem:[%s3116_s11 + $0xf2] sm:$0xff] }
 0x232   : > { %v1673_v3 = vadd.f32 %v1672_v20, %v1608_v46 }
 0x234   : > { %v1738_v51 = vadd.f32 %v1737_v40, %v1673_v3  ;;  %1869 = vmatmul.f32.gmra.mxu2 %v2738_v28  ;;  %v1135_v40 = vld [vmem:[%s3119_s19 + $0x818] sm:$0xff]  ;;  %v1133_v3 = vld [vmem:[%s3119_s19 + $0x808] sm:$0xff] }
 0x235   : > { %1934 = vmatmul.f32.gmra.mxu3 %v4015_v21  ;;  %v1740_v47 = vpop.f32.mrf.mxu0  ;;  %v4018_v42 = vpop.f32.mrf.mxu1  ;;  %2289 = vmatpush.msra.mxu1 %v1135_v40  ;;  %v4051_v40 = vld [vmem:[%s3116_s11 + $0x102] sm:$0xff] }
 0x236   : > { %2360 = vst [vmem:[%s3832_s28 + $0xa0] sm:$0xff] %v1738_v51 }
 0x237   : > { %v1610_v50 = vpop.f32.mrf.mxu2  ;;  %2290 = vmatpush.msra.mxu1 %v1133_v3 }
 0x238   : > { %v1675_v39 = vpop.f32.mrf.mxu3  ;;  %v1611_v6 = vadd.f32 %v1610_v50, %v3759_v33  ;;  %1999 = vmatmul.f32.gmra.mxu0 %v3766_v35  ;;  %2064 = vmatmul.f32.gmra.mxu1 %v2740_v53  ;;  %v1101_v33 = vld [vmem:[%s3119_s19 + $0x708] sm:$0xff] }
 0x239   : > { %2225 = vmatpush.msra.mxu0 %v1101_v33  ;;  %v2746_v33 = vld [vmem:[%s3116_s11 + $0x111] sm:$0xff] }
 0x23a   : > { %v1676_v59 = vadd.f32 %v1675_v39, %v1611_v6  ;;  %v2744_v39 = vld [vmem:[%s3116_s11 + $0x101] sm:$0xff] }
 0x23c   : > { %v1741_v58 = vadd.f32 %v1740_v47, %v1676_v59  ;;  %1872 = vmatmul.f32.gmra.mxu2 %v2740_v53 }
 0x23d   : > { %1937 = vmatmul.f32.gmra.mxu3 %v4029_v48  ;;  %v1743_v54 = vpop.f32.mrf.mxu0  ;;  %v4032_v20 = vpop.f32.mrf.mxu1 }
 0x23e   : > { %2362 = vst [vmem:[%s3832_s28 + $0xb0] sm:$0xff] %v1741_v58 }
 0x23f   : > { %v1613_v35 = vpop.f32.mrf.mxu2 }
 0x240   : > { %v1678_v46 = vpop.f32.mrf.mxu3  ;;  %v1614_v28 = vadd.f32 %v1613_v35, %v3772_v7  ;;  %2002 = vmatmul.f32.gmra.mxu0 %v3780_v41  ;;  %2067 = vmatmul.f32.gmra.mxu1 %v2742_v36 }
 0x242   : > { %v1679_v51 = vadd.f32 %v1678_v46, %v1614_v28  ;;  %v4061_v28 = vld [vmem:[%s3116_s11 + $0x112] sm:$0xff] }
 0x244   : > { %v1744_v47 = vadd.f32 %v1743_v54, %v1679_v51  ;;  %1875 = vmatmul.f32.gmra.mxu2 %v2742_v36 }
 0x245   : > { %1940 = vmatmul.f32.gmra.mxu3 %v4041_v0  ;;  %v1746_v60 = vpop.f32.mrf.mxu0  ;;  %v4044_v62 = vpop.f32.mrf.mxu1 }
 0x246   : > { %2364 = vst [vmem:[%s3832_s28 + $0xc0] sm:$0xff] %v1744_v47  ;;  %v4069_v47 = vld [vmem:[%s3116_s11 + $0x120] sm:$0xff] }
 0x247   : > { %v1616_v7 = vpop.f32.mrf.mxu2 }
 0x248   : > { %v1681_v41 = vpop.f32.mrf.mxu3  ;;  %v1617_v50 = vadd.f32 %v1616_v7, %v3786_v25  ;;  %2005 = vmatmul.f32.gmra.mxu0 %v3794_v11  ;;  %2070 = vmatmul.f32.gmra.mxu1 %v2744_v39  ;;  %v2750_v7 = vld [vmem:[%s3127_s27] sm:$0x3] }
 0x24a   : > { %v1682_v6 = vadd.f32 %v1681_v41, %v1617_v50  ;;  %v4077_v41 = vperm.slane %v2750_v7, 1 }
 0x24c   : > { %v1747_v53 = vadd.f32 %v1746_v60, %v1682_v6  ;;  %1878 = vmatmul.f32.gmra.mxu2 %v2744_v39  ;;  %v4073_v60 = vld [vmem:[%s3116_s11 + $0x121] sm:$0xff] }
 0x24d   : > { %1943 = vmatmul.f32.gmra.mxu3 %v4051_v40  ;;  %v1749_v59 = vpop.f32.mrf.mxu0  ;;  %v4054_v58 = vpop.f32.mrf.mxu1 }
 0x24e   : > { %2366 = vst [vmem:[%s3832_s28 + $0xd0] sm:$0xff] %v1747_v53 }
 0x24f   : > { %v1619_v54 = vpop.f32.mrf.mxu2 }
 0x250   : > { %v1684_v25 = vpop.f32.mrf.mxu3  ;;  %v1620_v11 = vadd.f32 %v1619_v54, %v3801_v43  ;;  %2008 = vmatmul.f32.gmra.mxu0 %v3808_v49  ;;  %2073 = vmatmul.f32.gmra.mxu1 %v2746_v33 }
 0x252   : > { %v1685_v35 = vadd.f32 %v1684_v25, %v1620_v11 }
 0x254   : > { %v1750_v46 = vadd.f32 %v1749_v59, %v1685_v35  ;;  %1881 = vmatmul.f32.gmra.mxu2 %v2746_v33  ;;  %v1776_v35 = vadd.f32 %v3830_v45, %v4077_v41  ;;  %v1779_v45 = vadd.f32 %v3853_v57, %v4077_v41  ;;  %v1782_v57 = vadd.f32 %v3874_v26, %v4077_v41 }
 0x255   : > { %1946 = vmatmul.f32.gmra.mxu3 %v4061_v28  ;;  %v1752_v36 = vpop.f32.mrf.mxu0  ;;  %v4064_v3 = vpop.f32.mrf.mxu1  ;;  %v1785_v26 = vadd.f32 %v3895_v23, %v4077_v41  ;;  %v1788_v23 = vadd.f32 %v3916_v5, %v4077_v41  ;;  %v1791_v5 = vadd.f32 %v3937_v13, %v4077_v41  ;;  %v1794_v13 = vadd.f32 %v3958_v1, %v4077_v41 }
 0x256   : > { %2368 = vst [vmem:[%s3832_s28 + $0xe0] sm:$0xff] %v1750_v46  ;;  %v1797_v1 = vadd.f32 %v3976_v17, %v4077_v41  ;;  %v1800_v17 = vadd.f32 %v3990_v56, %v4077_v41  ;;  %v1803_v56 = vadd.f32 %v4004_v4, %v4077_v41  ;;  %v1806_v4 = vadd.f32 %v4018_v42, %v4077_v41 }
 0x257   : > { %v1622_v51 = vpop.f32.mrf.mxu2  ;;  %v1809_v42 = vadd.f32 %v4032_v20, %v4077_v41  ;;  %v1812_v20 = vadd.f32 %v4044_v62, %v4077_v41  ;;  %v1815_v62 = vadd.f32 %v4054_v58, %v4077_v41  ;;  %v1818_v58 = vadd.f32 %v4064_v3, %v4077_v41 }
 0x258   : > { %v1687_v43 = vpop.f32.mrf.mxu3  ;;  %v1623_v49 = vadd.f32 %v1622_v51, %v3816_v34  ;;  %2011 = vmatmul.f32.gmra.mxu0 %v4069_v47  ;;  %2076 = vmatmul.f32.gmra.mxu1 %v4073_v60  ;;  %v1773_v34 = vadd.f32 %v3814_v12, %v4077_v41 }
 0x25a   : > { %v1688_v50 = vadd.f32 %v1687_v43, %v1623_v49 }
 0x25c   : > { %v1753_v39 = vadd.f32 %v1752_v36, %v1688_v50  ;;  %2096 = vmatmul.f32.vlgmr.msra.gmra.mxu2 %v3827_v22 }
 0x25d   : > { %2161 = vmatmul.f32.vlgmr.msra.gmra.mxu3 %v3840_v16  ;;  %v1967_v6 = vpop.f32.mrf.mxu0  ;;  %v2032_v53 = vpop.f32.mrf.mxu1 }
 0x25e   : > { %2370 = vst [vmem:[%s3832_s28 + $0xf0] sm:$0xff] %v1753_v39 }
 0x25f   : > { %v1837_v59 = vpop.f32.mrf.mxu2 }
 0x260   : > { %v1902_v54 = vpop.f32.mrf.mxu3  ;;  %v1838_v25 = vadd.f32 %v1837_v59, %v1773_v34  ;;  %2226 = vmatmul.f32.vlgmr.msra.gmra.mxu0 %v3844_v31  ;;  %2291 = vmatmul.f32.vlgmr.msra.gmra.mxu1 %v3850_v27 }
 0x262   : > { %v1903_v11 = vadd.f32 %v1902_v54, %v1838_v25 }
 0x264   : > { %v1968_v33 = vadd.f32 %v1967_v6, %v1903_v11  ;;  %2099 = vmatmul.f32.gmra.mxu2 %v3850_v27 }
 0x265   : > { %2164 = vmatmul.f32.gmra.mxu3 %v3861_v61  ;;  %v1970_v22 = vpop.f32.mrf.mxu0  ;;  %v2035_v16 = vpop.f32.mrf.mxu1 }
 0x266   : > { %v4090_v12 = vadd.f32 %v2032_v53, %v1968_v33 }
 0x267   : > { %v1840_v46 = vpop.f32.mrf.mxu2 }
 0x268   : > { %v1905_v36 = vpop.f32.mrf.mxu3  ;;  %v1841_v51 = vadd.f32 %v1840_v46, %v1776_v35  ;;  %2229 = vmatmul.f32.gmra.mxu0 %v3865_v37  ;;  %2294 = vmatmul.f32.gmra.mxu1 %v3871_v44 }
 0x26a   : > { %v1906_v31 = vadd.f32 %v1905_v36, %v1841_v51 }
 0x26c   : > { %v1971_v43 = vadd.f32 %v1970_v22, %v1906_v31  ;;  %2102 = vmatmul.f32.gmra.mxu2 %v3871_v44 }
 0x26d   : > { %2167 = vmatmul.f32.gmra.mxu3 %v3882_v10  ;;  %v1973_v27 = vpop.f32.mrf.mxu0  ;;  %v2038_v61 = vpop.f32.mrf.mxu1 }
 0x26e   : > { %v4098_v49 = vadd.f32 %v2035_v16, %v1971_v43 }
 0x26f   : > { %v1843_v7 = vpop.f32.mrf.mxu2 }
 0x270   : > { %v1908_v50 = vpop.f32.mrf.mxu3  ;;  %v1844_v39 = vadd.f32 %v1843_v7, %v1779_v45  ;;  %2232 = vmatmul.f32.gmra.mxu0 %v3886_v52  ;;  %2297 = vmatmul.f32.gmra.mxu1 %v3892_v24 }
 0x272   : > { %v1909_v37 = vadd.f32 %v1908_v50, %v1844_v39 }
 0x274   : > { %v1974_v6 = vadd.f32 %v1973_v27, %v1909_v37  ;;  %2105 = vmatmul.f32.gmra.mxu2 %v3892_v24 }
 0x275   : > { %2170 = vmatmul.f32.gmra.mxu3 %v3903_v15  ;;  %v1976_v44 = vpop.f32.mrf.mxu0  ;;  %v2041_v10 = vpop.f32.mrf.mxu1 }
 0x276   : > { %v4106_v53 = vadd.f32 %v2038_v61, %v1974_v6 }
 0x277   : > { %v1846_v34 = vpop.f32.mrf.mxu2 }
 0x278   : > { %v1911_v59 = vpop.f32.mrf.mxu3  ;;  %v1847_v54 = vadd.f32 %v1846_v34, %v1782_v57  ;;  %2235 = vmatmul.f32.gmra.mxu0 %v3907_v14  ;;  %2300 = vmatmul.f32.gmra.mxu1 %v3913_v18  ;;  %v2754_v34 = vld [vmem:[%s3116_s11 + $0x92] sm:$0xff] }
 0x27a   : > { %v1912_v52 = vadd.f32 %v1911_v59, %v1847_v54 }
 0x27c   : > { %v1977_v25 = vadd.f32 %v1976_v44, %v1912_v52  ;;  %2108 = vmatmul.f32.gmra.mxu2 %v3913_v18  ;;  %v2755_v52 = vld [vmem:[%s3116_s11 + $0xc0] sm:$0xff] }
 0x27d   : > { %2173 = vmatmul.f32.gmra.mxu3 %v3924_v9  ;;  %v1979_v24 = vpop.f32.mrf.mxu0  ;;  %v2044_v15 = vpop.f32.mrf.mxu1 }
 0x27e   : > { %v4114_v11 = vadd.f32 %v2041_v10, %v1977_v25 }
 0x27f   : > { %v1849_v33 = vpop.f32.mrf.mxu2 }
 0x280   : > { %v1914_v22 = vpop.f32.mrf.mxu3  ;;  %v1850_v16 = vadd.f32 %v1849_v33, %v1785_v26  ;;  %2238 = vmatmul.f32.gmra.mxu0 %v3928_v55  ;;  %2303 = vmatmul.f32.gmra.mxu1 %v3934_v29 }
 0x282   : > { %v1915_v14 = vadd.f32 %v1914_v22, %v1850_v16  ;;  %v2756_v16 = vld [vmem:[%s3116_s11 + $0xc1] sm:$0xff] }
 0x284   : > { %v1980_v35 = vadd.f32 %v1979_v24, %v1915_v14  ;;  %2111 = vmatmul.f32.gmra.mxu2 %v3934_v29 }
 0x285   : > { %2176 = vmatmul.f32.gmra.mxu3 %v3945_v8  ;;  %v1982_v18 = vpop.f32.mrf.mxu0  ;;  %v2047_v9 = vpop.f32.mrf.mxu1 }
 0x286   : > { %v4122_v46 = vadd.f32 %v2044_v15, %v1980_v35  ;;  %v2757_v35 = vld [vmem:[%s3116_s11 + $0xd0] sm:$0xff] }
 0x287   : > { %v1852_v36 = vpop.f32.mrf.mxu2 }
 0x288   : > { %v1917_v51 = vpop.f32.mrf.mxu3  ;;  %v1853_v31 = vadd.f32 %v1852_v36, %v1788_v23  ;;  %2241 = vmatmul.f32.gmra.mxu0 %v3949_v19  ;;  %2306 = vmatmul.f32.gmra.mxu1 %v3955_v30  ;;  %v2751_v19 = vld [vmem:[%s3116_s11 + $0x82] sm:$0xff] }
 0x28a   : > { %v1918_v55 = vadd.f32 %v1917_v51, %v1853_v31 }
 0x28c   : > { %v1983_v43 = vadd.f32 %v1982_v18, %v1918_v55  ;;  %2114 = vmatmul.f32.gmra.mxu2 %v3955_v30  ;;  %v2758_v55 = vld [vmem:[%s3116_s11 + $0xd1] sm:$0xff] }
 0x28d   : > { %2179 = vmatmul.f32.gmra.mxu3 %v3966_v32  ;;  %v1985_v29 = vpop.f32.mrf.mxu0  ;;  %v2050_v8 = vpop.f32.mrf.mxu1  ;;  %v2752_v32 = vld [vmem:[%s3116_s11 + $0x90] sm:$0xff] }
 0x28e   : > { %v4130_v27 = vadd.f32 %v2047_v9, %v1983_v43 }
 0x28f   : > { %v1855_v61 = vpop.f32.mrf.mxu2 }
 0x290   : > { %v1920_v45 = vpop.f32.mrf.mxu3  ;;  %v1856_v7 = vadd.f32 %v1855_v61, %v1791_v5  ;;  %2244 = vmatmul.f32.gmra.mxu0 %v3970_v2  ;;  %2309 = vmatmul.f32.gmra.mxu1 %v2751_v19  ;;  %v2753_v2 = vld [vmem:[%s3116_s11 + $0x91] sm:$0xff] }
 0x292   : > { %v1921_v50 = vadd.f32 %v1920_v45, %v1856_v7 }
 0x294   : > { %v1986_v30 = vadd.f32 %v1985_v29, %v1921_v50  ;;  %2117 = vmatmul.f32.gmra.mxu2 %v2751_v19  ;;  %v2759_v29 = vld [vmem:[%s3116_s11 + $0xe0] sm:$0xff] }
 0x295   : > { %2182 = vmatmul.f32.gmra.mxu3 %v2752_v32  ;;  %v1988_v39 = vpop.f32.mrf.mxu0  ;;  %v2053_v37 = vpop.f32.mrf.mxu1  ;;  %v2760_v50 = vld [vmem:[%s3116_s11 + $0xe1] sm:$0xff]  ;;  %v2761_v32 = vld [vmem:[%s3116_s11 + $0xf0] sm:$0xff] }
 0x296   : > { %v4137_v6 = vadd.f32 %v2050_v8, %v1986_v30 }
 0x297   : > { %v1858_v44 = vpop.f32.mrf.mxu2 }
 0x298   : > { %v1923_v10 = vpop.f32.mrf.mxu3  ;;  %v1859_v57 = vadd.f32 %v1858_v44, %v1794_v13  ;;  %2247 = vmatmul.f32.gmra.mxu0 %v2753_v2  ;;  %2312 = vmatmul.f32.gmra.mxu1 %v2754_v34  ;;  %v2762_v2 = vld [vmem:[%s3116_s11 + $0xf1] sm:$0xff] }
 0x29a   : > { %v1924_v59 = vadd.f32 %v1923_v10, %v1859_v57 }
 0x29c   : > { %v1989_v54 = vadd.f32 %v1988_v39, %v1924_v59  ;;  %2120 = vmatmul.f32.gmra.mxu2 %v3987_v63  ;;  %v2763_v59 = vld [vmem:[%s3116_s11 + $0x100] sm:$0xff] }
 0x29d   : > { %2185 = vmatmul.f32.gmra.mxu3 %v2755_v52  ;;  %v1991_v25 = vpop.f32.mrf.mxu0  ;;  %v2056_v24 = vpop.f32.mrf.mxu1 }
 0x29e   : > { %v4145_v15 = vadd.f32 %v2053_v37, %v1989_v54 }
 0x29f   : > { %v1861_v26 = vpop.f32.mrf.mxu2 }
 0x2a0   : > { %v1926_v33 = vpop.f32.mrf.mxu3  ;;  %v1862_v22 = vadd.f32 %v1861_v26, %v1797_v1  ;;  %2250 = vmatmul.f32.gmra.mxu0 %v2756_v16  ;;  %2315 = vmatmul.f32.gmra.mxu1 %v4001_v38  ;;  %v2765_v16 = vld [vmem:[%s3116_s11 + $0x110] sm:$0xff] }
 0x2a2   : > { %v1927_v14 = vadd.f32 %v1926_v33, %v1862_v22  ;;  %v2764_v33 = vld [vmem:[%s3116_s11 + $0x101] sm:$0xff] }
 0x2a4   : > { %v1992_v63 = vadd.f32 %v1991_v25, %v1927_v14  ;;  %2123 = vmatmul.f32.gmra.mxu2 %v4001_v38 }
 0x2a5   : > { %2188 = vmatmul.f32.gmra.mxu3 %v2757_v35  ;;  %v1994_v18 = vpop.f32.mrf.mxu0  ;;  %v2059_v9 = vpop.f32.mrf.mxu1 }
 0x2a6   : > { %v4153_v23 = vadd.f32 %v2056_v24, %v1992_v63 }
 0x2a7   : > { %v1864_v36 = vpop.f32.mrf.mxu2 }
 0x2a8   : > { %v1929_v51 = vpop.f32.mrf.mxu3  ;;  %v1865_v31 = vadd.f32 %v1864_v36, %v1800_v17  ;;  %2253 = vmatmul.f32.gmra.mxu0 %v2758_v55  ;;  %2318 = vmatmul.f32.gmra.mxu1 %v4015_v21  ;;  %v2766_v36 = vld [vmem:[%s3116_s11 + $0x111] sm:$0xff] }
 0x2aa   : > { %v1930_v43 = vadd.f32 %v1929_v51, %v1865_v31 }
 0x2ac   : > { %v1995_v38 = vadd.f32 %v1994_v18, %v1930_v43  ;;  %2126 = vmatmul.f32.gmra.mxu2 %v4015_v21 }
 0x2ad   : > { %2191 = vmatmul.f32.gmra.mxu3 %v2759_v29  ;;  %v1997_v8 = vpop.f32.mrf.mxu0  ;;  %v2062_v5 = vpop.f32.mrf.mxu1 }
 0x2ae   : > { %v4161_v61 = vadd.f32 %v2059_v9, %v1995_v38 }
 0x2af   : > { %v1867_v45 = vpop.f32.mrf.mxu2 }
 0x2b0   : > { %v1932_v7 = vpop.f32.mrf.mxu3  ;;  %v1868_v19 = vadd.f32 %v1867_v45, %v1803_v56  ;;  %2256 = vmatmul.f32.gmra.mxu0 %v2760_v50  ;;  %2321 = vmatmul.f32.gmra.mxu1 %v4029_v48 }
 0x2b2   : > { %v1933_v30 = vadd.f32 %v1932_v7, %v1868_v19 }
 0x2b4   : > { %v1998_v21 = vadd.f32 %v1997_v8, %v1933_v30  ;;  %2129 = vmatmul.f32.gmra.mxu2 %v4029_v48 }
 0x2b5   : > { %2194 = vmatmul.f32.gmra.mxu3 %v2761_v32  ;;  %v2000_v39 = vpop.f32.mrf.mxu0  ;;  %v2065_v37 = vpop.f32.mrf.mxu1  ;;  %v2769_v32 = vld [vmem:[%s3116_s11 + $0x131] sm:$0xff] }
 0x2b6   : > { %v4169_v13 = vadd.f32 %v2062_v5, %v1998_v21  ;;  %v2767_v5 = vld [vmem:[%s3116_s11 + $0x122] sm:$0xff] }
 0x2b7   : > { %v1870_v44 = vpop.f32.mrf.mxu2 }
 0x2b8   : > { %v1935_v10 = vpop.f32.mrf.mxu3  ;;  %v1871_v57 = vadd.f32 %v1870_v44, %v1806_v4  ;;  %2259 = vmatmul.f32.gmra.mxu0 %v2762_v2  ;;  %2324 = vmatmul.f32.gmra.mxu1 %v4041_v0 }
 0x2ba   : > { %v1936_v34 = vadd.f32 %v1935_v10, %v1871_v57 }
 0x2bc   : > { %v2001_v48 = vadd.f32 %v2000_v39, %v1936_v34  ;;  %2132 = vmatmul.f32.gmra.mxu2 %v4041_v0 }
 0x2bd   : > { %2197 = vmatmul.f32.gmra.mxu3 %v2763_v59  ;;  %v2003_v54 = vpop.f32.mrf.mxu0  ;;  %v2068_v52 = vpop.f32.mrf.mxu1 }
 0x2be   : > { %v4177_v25 = vadd.f32 %v2065_v37, %v2001_v48 }
 0x2bf   : > { %v1873_v24 = vpop.f32.mrf.mxu2 }
 0x2c0   : > { %v1938_v1 = vpop.f32.mrf.mxu3  ;;  %v1874_v26 = vadd.f32 %v1873_v24, %v1809_v42  ;;  %2262 = vmatmul.f32.gmra.mxu0 %v2764_v33  ;;  %2327 = vmatmul.f32.gmra.mxu1 %v4051_v40 }
 0x2c2   : > { %v1939_v22 = vadd.f32 %v1938_v1, %v1874_v26 }
 0x2c4   : > { %v2004_v0 = vadd.f32 %v2003_v54, %v1939_v22  ;;  %2135 = vmatmul.f32.gmra.mxu2 %v4051_v40 }
 0x2c5   : > { %2200 = vmatmul.f32.gmra.mxu3 %v2765_v16  ;;  %v2006_v14 = vpop.f32.mrf.mxu0  ;;  %v2071_v63 = vpop.f32.mrf.mxu1 }
 0x2c6   : > { %v4185_v35 = vadd.f32 %v2068_v52, %v2004_v0 }
 0x2c7   : > { %v1876_v18 = vpop.f32.mrf.mxu2 }
 0x2c8   : > { %v1941_v9 = vpop.f32.mrf.mxu3  ;;  %v1877_v17 = vadd.f32 %v1876_v18, %v1812_v20  ;;  %2265 = vmatmul.f32.gmra.mxu0 %v2766_v36  ;;  %2330 = vmatmul.f32.gmra.mxu1 %v4061_v28 }
 0x2ca   : > { %v1942_v51 = vadd.f32 %v1941_v9, %v1877_v17 }
 0x2cc   : > { %v2007_v31 = vadd.f32 %v2006_v14, %v1942_v51  ;;  %2138 = vmatmul.f32.gmra.mxu2 %v4061_v28 }
 0x2cd   : > { %2203 = vmatmul.f32.gmra.mxu3 %v4069_v47  ;;  %v2009_v40 = vpop.f32.mrf.mxu0  ;;  %v2074_v55 = vpop.f32.mrf.mxu1  ;;  %v2768_v47 = vld [vmem:[%s3116_s11 + $0x130] sm:$0xff] }
 0x2ce   : > { %v4193_v43 = vadd.f32 %v2071_v63, %v2007_v31 }
 0x2cf   : > { %v1879_v38 = vpop.f32.mrf.mxu2 }
 0x2d0   : > { %v1944_v29 = vpop.f32.mrf.mxu3  ;;  %v1880_v8 = vadd.f32 %v1879_v38, %v1815_v62  ;;  %2268 = vmatmul.f32.gmra.mxu0 %v4073_v60  ;;  %2333 = vmatmul.f32.gmra.mxu1 %v2767_v5  ;;  %v2770_v60 = vld [vmem:[%s3116_s11 + $0x132] sm:$0xff]  ;;  %s2847_s11 = scalar_lea.hbm %s4275_s3, 512 }
 0x2d1   : > { %p2849_p13 = scmp.lt.s32.totalorder %s2847_s11, %s2843_s8 }
 0x2d2   : > { %v1945_v56 = vadd.f32 %v1944_v29, %v1880_v8 }
 0x2d3   : > { %p2850_p0 = por %p2849_p13, %p2848_p12 }
 0x2d4   : > { %v2010_v28 = vadd.f32 %v2009_v40, %v1945_v56  ;;  %2141 = vmatmul.f32.gmra.mxu2 %v2767_v5 }
 0x2d5   : > { %2206 = vmatmul.f32.gmra.mxu3 %v2768_v47  ;;  %v2012_v45 = vpop.f32.mrf.mxu0  ;;  %v2077_v7 = vpop.f32.mrf.mxu1  ;;  %p2851_p1 = pnand %p2850_p0, %p2846_p8 }
 0x2d6   : > { %v4200_v19 = vadd.f32 %v2074_v55, %v2010_v28 }
 0x2d7   : > { %v1882_v50 = vpop.f32.mrf.mxu2 }
 0x2d8   : > { %v1947_v30 = vpop.f32.mrf.mxu3  ;;  %v1883_v21 = vadd.f32 %v1882_v50, %v1818_v58  ;;  %2271 = vmatmul.f32.gmra.mxu0 %v2769_v32  ;;  %2336 = vmatmul.f32.gmra.mxu1 %v2770_v60 }
 0x2da   : > { %v1948_v39 = vadd.f32 %v1947_v30, %v1883_v21 }
 0x2dc   : > { %v2013_v37 = vadd.f32 %v2012_v45, %v1948_v39 }
 0x2dd   : > { %v2227_v4 = vpop.f32.mrf.mxu0  ;;  %v2292_v44 = vpop.f32.mrf.mxu1 }
 0x2de   : > { %v4204_v10 = vadd.f32 %v2077_v7, %v2013_v37 }
 0x2df   : > { %v2097_v57 = vpop.f32.mrf.mxu2 }
 0x2e0   : > { %v2162_v2 = vpop.f32.mrf.mxu3  ;;  %v2098_v3 = vadd.f32 %v2097_v57, %v4090_v12 }
 0x2e2   : > { %v2163_v41 = vadd.f32 %v2162_v2, %v2098_v3 }
 0x2e4   : > { %v2228_v34 = vadd.f32 %v2227_v4, %v2163_v41 }
 0x2e5   : > { %v2230_v48 = vpop.f32.mrf.mxu0  ;;  %v2295_v59 = vpop.f32.mrf.mxu1 }
 0x2e6   : > { %v2293_v54 = vadd.f32 %v2292_v44, %v2228_v34 }
 0x2e7   : > { %v2100_v52 = vpop.f32.mrf.mxu2 }
 0x2e8   : > { %v2165_v42 = vpop.f32.mrf.mxu3  ;;  %2341 = vst [vmem:[%s3832_s28 + $0x8] sm:$0xff] %v2293_v54  ;;  %v2101_v24 = vadd.f32 %v2100_v52, %v4098_v49 }
 0x2ea   : > { %v2166_v1 = vadd.f32 %v2165_v42, %v2101_v24 }
 0x2ec   : > { %v2231_v26 = vadd.f32 %v2230_v48, %v2166_v1 }
 0x2ed   : > { %v2233_v33 = vpop.f32.mrf.mxu0  ;;  %v2298_v22 = vpop.f32.mrf.mxu1 }
 0x2ee   : > { %v2296_v0 = vadd.f32 %v2295_v59, %v2231_v26 }
 0x2ef   : > { %v2103_v16 = vpop.f32.mrf.mxu2 }
 0x2f0   : > { %v2168_v14 = vpop.f32.mrf.mxu3  ;;  %2343 = vst [vmem:[%s3832_s28 + $0x18] sm:$0xff] %v2296_v0  ;;  %v2104_v12 = vadd.f32 %v2103_v16, %v4106_v53 }
 0x2f2   : > { %v2169_v63 = vadd.f32 %v2168_v14, %v2104_v12 }
 0x2f4   : > { %v2234_v20 = vadd.f32 %v2233_v33, %v2169_v63 }
 0x2f5   : > { %v2236_v18 = vpop.f32.mrf.mxu0  ;;  %v2301_v9 = vpop.f32.mrf.mxu1 }
 0x2f6   : > { %v2299_v17 = vadd.f32 %v2298_v22, %v2234_v20 }
 0x2f7   : > { %v2106_v36 = vpop.f32.mrf.mxu2 }
 0x2f8   : > { %v2171_v51 = vpop.f32.mrf.mxu3  ;;  %2345 = vst [vmem:[%s3832_s28 + $0x28] sm:$0xff] %v2299_v17  ;;  %v2107_v49 = vadd.f32 %v2106_v36, %v4114_v11 }
 0x2fa   : > { %v2172_v31 = vadd.f32 %v2171_v51, %v2107_v49 }
 0x2fc   : > { %v2237_v40 = vadd.f32 %v2236_v18, %v2172_v31 }
 0x2fd   : > { %v2239_v55 = vpop.f32.mrf.mxu0  ;;  %v2304_v62 = vpop.f32.mrf.mxu1 }
 0x2fe   : > { %v2302_v38 = vadd.f32 %v2301_v9, %v2237_v40 }
 0x2ff   : > { %v2109_v29 = vpop.f32.mrf.mxu2 }
 0x300   : > { %v2174_v8 = vpop.f32.mrf.mxu3  ;;  %2347 = vst [vmem:[%s3832_s28 + $0x38] sm:$0xff] %v2302_v38  ;;  %v2110_v53 = vadd.f32 %v2109_v29, %v4122_v46 }
 0x302   : > { %v2175_v5 = vadd.f32 %v2174_v8, %v2110_v53 }
 0x304   : > { %v2240_v56 = vadd.f32 %v2239_v55, %v2175_v5 }
 0x305   : > { %v2242_v28 = vpop.f32.mrf.mxu0  ;;  %v2307_v47 = vpop.f32.mrf.mxu1 }
 0x306   : > { %v2305_v45 = vadd.f32 %v2304_v62, %v2240_v56 }
 0x307   : > { %v2112_v7 = vpop.f32.mrf.mxu2 }
 0x308   : > { %v2177_v58 = vpop.f32.mrf.mxu3  ;;  %2349 = vst [vmem:[%s3832_s28 + $0x48] sm:$0xff] %v2305_v45  ;;  %v2113_v11 = vadd.f32 %v2112_v7, %v4130_v27 }
 0x30a   : > { %v2178_v50 = vadd.f32 %v2177_v58, %v2113_v11 }
 0x30c   : > { %v2243_v30 = vadd.f32 %v2242_v28, %v2178_v50 }
 0x30d   : > { %v2245_v21 = vpop.f32.mrf.mxu0  ;;  %v2310_v32 = vpop.f32.mrf.mxu1 }
 0x30e   : > { %v2308_v60 = vadd.f32 %v2307_v47, %v2243_v30 }
 0x30f   : > { %v2115_v39 = vpop.f32.mrf.mxu2 }
 0x310   : > { %v2180_v37 = vpop.f32.mrf.mxu3  ;;  %2351 = vst [vmem:[%s3832_s28 + $0x58] sm:$0xff] %v2308_v60  ;;  %v2116_v46 = vadd.f32 %v2115_v39, %v4137_v6 }
 0x312   : > { %v2181_v4 = vadd.f32 %v2180_v37, %v2116_v46 }
 0x314   : > { %v2246_v44 = vadd.f32 %v2245_v21, %v2181_v4 }
 0x315   : > { %v2248_v57 = vpop.f32.mrf.mxu0  ;;  %v2313_v2 = vpop.f32.mrf.mxu1 }
 0x316   : > { %v2311_v3 = vadd.f32 %v2310_v32, %v2246_v44 }
 0x317   : > { %v2118_v41 = vpop.f32.mrf.mxu2 }
 0x318   : > { %v2183_v34 = vpop.f32.mrf.mxu3  ;;  %2353 = vst [vmem:[%s3832_s28 + $0x68] sm:$0xff] %v2311_v3  ;;  %v2119_v27 = vadd.f32 %v2118_v41, %v4145_v15 }
 0x31a   : > { %v2184_v48 = vadd.f32 %v2183_v34, %v2119_v27 }
 0x31c   : > { %v2249_v59 = vadd.f32 %v2248_v57, %v2184_v48 }
 0x31d   : > { %v2251_v54 = vpop.f32.mrf.mxu0  ;;  %v2316_v52 = vpop.f32.mrf.mxu1 }
 0x31e   : > { %v2314_v42 = vadd.f32 %v2313_v2, %v2249_v59 }
 0x31f   : > { %v2121_v24 = vpop.f32.mrf.mxu2 }
 0x320   : > { %v2186_v1 = vpop.f32.mrf.mxu3  ;;  %2355 = vst [vmem:[%s3832_s28 + $0x78] sm:$0xff] %v2314_v42  ;;  %v2122_v6 = vadd.f32 %v2121_v24, %v4153_v23 }
 0x322   : > { %v2187_v26 = vadd.f32 %v2186_v1, %v2122_v6 }
 0x324   : > { %v2252_v33 = vadd.f32 %v2251_v54, %v2187_v26 }
 0x325   : > { %v2254_v22 = vpop.f32.mrf.mxu0  ;;  %v2319_v0 = vpop.f32.mrf.mxu1 }
 0x326   : > { %v2317_v16 = vadd.f32 %v2316_v52, %v2252_v33 }
 0x327   : > { %v2124_v14 = vpop.f32.mrf.mxu2 }
 0x328   : > { %v2189_v12 = vpop.f32.mrf.mxu3  ;;  %2357 = vst [vmem:[%s3832_s28 + $0x88] sm:$0xff] %v2317_v16  ;;  %v2125_v15 = vadd.f32 %v2124_v14, %v4161_v61 }
 0x32a   : > { %v2190_v63 = vadd.f32 %v2189_v12, %v2125_v15 }
 0x32c   : > { %v2255_v20 = vadd.f32 %v2254_v22, %v2190_v63 }
 0x32d   : > { %v2257_v18 = vpop.f32.mrf.mxu0  ;;  %v2322_v9 = vpop.f32.mrf.mxu1 }
 0x32e   : > { %v2320_v17 = vadd.f32 %v2319_v0, %v2255_v20 }
 0x32f   : > { %v2127_v36 = vpop.f32.mrf.mxu2 }
 0x330   : > { %v2192_v51 = vpop.f32.mrf.mxu3  ;;  %2359 = vst [vmem:[%s3832_s28 + $0x98] sm:$0xff] %v2320_v17  ;;  %v2128_v23 = vadd.f32 %v2127_v36, %v4169_v13 }
 0x332   : > { %v2193_v49 = vadd.f32 %v2192_v51, %v2128_v23 }
 0x334   : > { %v2258_v31 = vadd.f32 %v2257_v18, %v2193_v49 }
 0x335   : > { %v2260_v40 = vpop.f32.mrf.mxu0  ;;  %v2325_v55 = vpop.f32.mrf.mxu1 }
 0x336   : > { %v2323_v62 = vadd.f32 %v2322_v9, %v2258_v31 }
 0x337   : > { %v2130_v38 = vpop.f32.mrf.mxu2 }
 0x338   : > { %v2195_v29 = vpop.f32.mrf.mxu3  ;;  %2361 = vst [vmem:[%s3832_s28 + $0xa8] sm:$0xff] %v2323_v62  ;;  %v2131_v61 = vadd.f32 %v2130_v38, %v4177_v25 }
 0x33a   : > { %v2196_v8 = vadd.f32 %v2195_v29, %v2131_v61 }
 0x33c   : > { %v2261_v53 = vadd.f32 %v2260_v40, %v2196_v8 }
 0x33d   : > { %v2263_v5 = vpop.f32.mrf.mxu0  ;;  %v2328_v56 = vpop.f32.mrf.mxu1 }
 0x33e   : > { %v2326_v28 = vadd.f32 %v2325_v55, %v2261_v53 }
 0x33f   : > { %v2133_v47 = vpop.f32.mrf.mxu2 }
 0x340   : > { %v2198_v45 = vpop.f32.mrf.mxu3  ;;  %2363 = vst [vmem:[%s3832_s28 + $0xb8] sm:$0xff] %v2326_v28  ;;  %v2134_v13 = vadd.f32 %v2133_v47, %v4185_v35 }
 0x342   : > { %v2199_v7 = vadd.f32 %v2198_v45, %v2134_v13 }
 0x344   : > { %v2264_v58 = vadd.f32 %v2263_v5, %v2199_v7 }
 0x345   : > { %v2266_v11 = vpop.f32.mrf.mxu0  ;;  %v2331_v30 = vpop.f32.mrf.mxu1 }
 0x346   : > { %v2329_v50 = vadd.f32 %v2328_v56, %v2264_v58 }
 0x347   : > { %v2136_v21 = vpop.f32.mrf.mxu2 }
 0x348   : > { %v2201_v25 = vpop.f32.mrf.mxu3  ;;  %2365 = vst [vmem:[%s3832_s28 + $0xc8] sm:$0xff] %v2329_v50  ;;  %v2137_v32 = vadd.f32 %v2136_v21, %v4193_v43 }
 0x34a   : > { %v2202_v60 = vadd.f32 %v2201_v25, %v2137_v32 }
 0x34c   : > { %v2267_v39 = vadd.f32 %v2266_v11, %v2202_v60 }
 0x34d   : > { %v2269_v46 = vpop.f32.mrf.mxu0  ;;  %v2334_v57 = vpop.f32.mrf.mxu1 }
 0x34e   : > { %v2332_v37 = vadd.f32 %v2331_v30, %v2267_v39 }
 0x34f   : > { %v2139_v4 = vpop.f32.mrf.mxu2 }
 0x350   : > { %v2204_v35 = vpop.f32.mrf.mxu3  ;;  %2367 = vst [vmem:[%s3832_s28 + $0xd8] sm:$0xff] %v2332_v37  ;;  %v2140_v44 = vadd.f32 %v2139_v4, %v4200_v19 }
 0x352   : > { %v2205_v2 = vadd.f32 %v2204_v35, %v2140_v44 }
 0x354   : > { %v2270_v3 = vadd.f32 %v2269_v46, %v2205_v2 }
 0x355   : > { %v2272_v48 = vpop.f32.mrf.mxu0  ;;  %v2337_v59 = vpop.f32.mrf.mxu1 }
 0x356   : > { %v2335_v41 = vadd.f32 %v2334_v57, %v2270_v3 }
 0x357   : > { %v2142_v34 = vpop.f32.mrf.mxu2 }
 0x358   : > { %v2207_v43 = vpop.f32.mrf.mxu3  ;;  %2369 = vst [vmem:[%s3832_s28 + $0xe8] sm:$0xff] %v2335_v41  ;;  %v2143_v27 = vadd.f32 %v2142_v34, %v4204_v10 }
 0x35a   : > { %v2208_v19 = vadd.f32 %v2207_v43, %v2143_v27 }
 0x35c   : > { %v2273_v54 = vadd.f32 %v2272_v48, %v2208_v19 }
 0x35e   : > { %v2338_v52 = vadd.f32 %v2337_v59, %v2273_v54 }
 0x360   : > { %2371 = vst [vmem:[%s3832_s28 + $0xf8] sm:$0xff] %v2338_v52 }
 0x361   : > { %2854 = shalt.err (!%p2851_p1)
}
 0x362   : > { %s2901_s6 = smov 256   ;;  %s2902_s29 = smov 512  }
 0x363   : > { %s2903_s30 = smov 16  }
 0x364   : > { %2655 = dma.vmem_to_hbm [thread:$0]  (%p2972_p9), %s2386_s20, 4096, %s2388_s26, %s2373_s16, %s2901_s6, %s2902_s29, %s2903_s30  }
 0x365 PF: > { %s2402_s27 = sand.u32 1, %s2885_s12   ;;  %p2658_p2 = pnand %p2504_p11, %p2976_p10 }
 0x366   : > { %s2403_s23 = scalar_lea.sflag [#allocation6], %s2402_s27 }
 0x367   : > { %p2659_p3 = pneg %p2658_p2 }
 0x369   : > { %2880 = dma.done.wait (%p2659_p3), %s2403_s23, 4096  }
 0x36a   : > { %2882 = vsyncadd (%p2659_p3), %s2403_s23, 4294963200  ;;  %p19_p4 = scmp.ge.s32.totalorder %s2949_s18, 4   ;;  %s4293_s12 = smov %s2889_s13 }
 0x36b   : > { %s4294_s13 = smov %s2893_s14  ;;  %s4295_s14 = smov %s2961_s21 }
 0x36c   : > { %s4296_s15 = smov %s2949_s18  ;;  %21 = sbr.rel (!%p19_p4) target bundleno = 9 (0x9), region = 138 }
 0x371   :  { %2409 = vsyncpa [#allocation5], 1 }
 0x372   :  { %2411 = vsyncpa [#allocation5 + $0x1], 1 }
 0x373   :  { %2412 = vsyncpa [#allocation8], 1 }
 0x374   :  { %2414 = vsyncpa [#allocation8 + $0x1], 1 }
 0x375   :  { %2415 = vsyncpa [#allocation6], 1 }
 0x376   :  { %2417 = vsyncpa [#allocation6 + $0x1], 1 }

</bundles_post_ra>
